<compile_context>
chip_gen: v5e
topology: v5e:2x2
jax: 0.10.0
libtpu: 0.0.40
codegen_flags: <defaults>
</compile_context>

<pallas_src>
import numpy as np

import jax
import jax.numpy as jnp
from jax.experimental import pallas as pl
from jax.experimental.pallas import tpu as pltpu

_PACK = 8  # rays packed per row of the kernel input / output


def _round_up(x, m):
    return ((x + m - 1) // m) * m


def _stratified_matmul_kernel(od_ref, basis_ref, pts_ref):
    # od_ref:    (TP, 64)        packed [ox,oy,oz,dx,dy,dz,0,0] x 8 rays per row
    # basis_ref: (64, 8*P*3)     constant block-diagonal basis, resident in VMEM
    # pts_ref:   (TP, 8*P*3)     lane-dense packed sample points
    pts = jnp.dot(
        od_ref[...],
        basis_ref[...],
        precision=jax.lax.Precision.HIGHEST,       # keep f32 accuracy on the MXU
        preferred_element_type=jnp.float32,
    )
    pts_ref[...] = pts.astype(pts_ref.dtype)


def _build_basis(p, min_depth, max_depth):
    """Constant (64, 8*P*3) block-diagonal basis and the z_vals it encodes."""
    z = np.linspace(np.float32(min_depth), np.float32(max_depth), p,
                    dtype=np.float32)
    small = np.zeros((8, 3 * p), np.float32)
    for c in range(3):
        small[c, c::3] = 1.0          # origin channel c
        small[3 + c, c::3] = z        # direction channel c scaled by z[k]
    cols = _PACK * 3 * p
    big = np.zeros((_PACK * 8, cols), np.float32)
    for s in range(_PACK):
        big[8 * s:8 * s + 8, 3 * p * s:3 * p * (s + 1)] = small
    return big, z


def stratified_raysampler(origins, directions, *, n_pts_per_ray, min_depth,
                          max_depth, tile_rays=None, out_dtype=jnp.float32):
    """origins, directions: (N, 3) float.

    Returns (sample_points (N, P, 3), sample_lengths (N, P, 1)) in out_dtype.
    """
    n = origins.shape[0]
    p = int(n_pts_per_ray)
    assert origins.shape == (n, 3) and directions.shape == (n, 3)

    cols = _PACK * 3 * p                               # packed output lane width
    itemsize = jnp.dtype(out_dtype).itemsize
    bytes_per_ray = 3 * p * itemsize

    # --- Tile sizing: ~6 MiB output blocks, tile a multiple of 64 rays. ---------
    default_tile = max(64, (int((6 << 20) // max(bytes_per_ray, 1)) // 64) * 64)
    if tile_rays is None:
        tile_rays = default_tile
    tile_rays = max(64, (int(tile_rays) // 64) * 64)

    n64 = _round_up(max(n, 1), 64)
    tile_rays = min(tile_rays, n64)
    # v7x megacore: prefer >= 2 grid steps when there is enough work.
    if tile_rays == n64 and n64 >= 128:
        tile_rays = _round_up(n64 // 2, 64)
    n_pad = _round_up(n64, tile_rays)
    grid = (n_pad // tile_rays,)

    # --- Pack inputs: (N,3)+(N,3) -> (N_pad, 8) -> (N_pad/8, 64). --------------
    o = origins.astype(jnp.float32)
    d = directions.astype(jnp.float32)
    if n_pad != n:
        pad = n_pad - n
        o = jnp.pad(o, ((0, pad), (0, 0)))
        d = jnp.pad(d, ((0, pad), (0, 0)))
    od = jnp.concatenate([o, d, jnp.zeros((n_pad, 2), jnp.float32)], axis=1)
    od_packed = od.reshape(n_pad // _PACK, _PACK * 8)          # (N_pad/8, 64)

    basis_np, z_np = _build_basis(p, float(min_depth), float(max_depth))
    basis = jnp.asarray(basis_np)                              # (64, 8*P*3)

    tp = tile_rays // _PACK
    out_block_bytes = tp * cols * itemsize
    in_block_bytes = tp * 64 * 4
    basis_bytes = basis.size * 4
    vmem_bytes = 2 * (out_block_bytes + in_block_bytes + basis_bytes) + (4 << 20)
    vmem_bytes = int(min(max(vmem_bytes, 16 << 20), 40 << 20))

    pts_packed = pl.pallas_call(
        _stratified_matmul_kernel,
        grid=grid,
        in_specs=[
            pl.BlockSpec((tp, 64), lambda i: (i, 0)),
            pl.BlockSpec((_PACK * 8, cols), lambda i: (0, 0)),  # resident constant
        ],
        out_specs=pl.BlockSpec((tp, cols), lambda i: (i, 0)),
        out_shape=jax.ShapeDtypeStruct((n_pad // _PACK, cols), out_dtype),
        compiler_params=pltpu.CompilerParams(
            dimension_semantics=("parallel",),
            vmem_limit_bytes=vmem_bytes),
    )(od_packed, basis)

    # Free, contiguous reshape back to (N, P, 3) in original ray order.
    sample_points = pts_packed.reshape(n_pad, p, 3)[:n]

    # sample_lengths are ray-independent: computed in the wrapper.
    z = jnp.asarray(z_np)
    sample_lengths = jnp.broadcast_to(z[None, :, None], (n, p, 1)).astype(out_dtype)

    # TODO(synk): ray_bundle._replace(...) namedtuple plumbing stays in Python;
    # the kernel only produces the tensors.
    return sample_points, sample_lengths


def _reference(origins, directions, n_pts_per_ray, min_depth, max_depth):
    z = jnp.linspace(min_depth, max_depth, n_pts_per_ray, dtype=jnp.float32)
    pts = origins[:, None, :] + directions[:, None, :] * z[None, :, None]
    lens = jnp.broadcast_to(z[None, :, None],
                            (origins.shape[0], n_pts_per_ray, 1))
    return pts, lens


if __name__ == "__main__":
    # cfg: n_pts_per_ray=64, min_depth=0.1, max_depth=5.0
    N_PTS = 64
    MIN_D = 0.1
    MAX_D = 5.0
    N_RAYS = 20  # deliberately not a multiple of 8/64 to exercise the padding path

    key = jax.random.PRNGKey(0)
    k_o, k_d = jax.random.split(key)
    origins = jax.random.normal(k_o, (N_RAYS, 3), dtype=jnp.float32)
    directions = jax.random.normal(k_d, (N_RAYS, 3), dtype=jnp.float32)
    directions = directions / jnp.linalg.norm(directions, axis=-1, keepdims=True)

    pts, lens = stratified_raysampler(
        origins, directions,
        n_pts_per_ray=N_PTS, min_depth=MIN_D, max_depth=MAX_D)
    jax.block_until_ready((pts, lens))

    ref_pts, ref_lens = _reference(origins, directions, N_PTS, MIN_D, MAX_D)
    assert pts.shape == (N_RAYS, N_PTS, 3)
    assert lens.shape == (N_RAYS, N_PTS, 1)
    assert jnp.allclose(pts, ref_pts, atol=1e-4, rtol=1e-4)
    assert jnp.allclose(lens, ref_lens, atol=1e-6, rtol=1e-6)

    print("KERNEL_OK")
</pallas_src>

<mosaic_0001>
module attributes {stable_mosaic.version = 11 : i64} {
  func.func @_stratified_matmul_kernel(%arg0: i32, %arg1: memref<8x64xf32, #tpu.memory_space<vmem>>, %arg2: memref<64x1536xf32, #tpu.memory_space<vmem>>, %arg3: memref<8x1536xf32, #tpu.memory_space<vmem>>) attributes {dimension_semantics = [#tpu.dimension_semantics<parallel>], iteration_bounds = array<i64: 1>, scalar_prefetch = 0 : i64, scratch_operands = 0 : i64, tpu.core_type = #tpu.core_type<tc>, window_params = [{transform_indices = @transform_0, window_bounds = array<i64: 8, 64>}, {pipeline_mode = #tpu.pipeline_mode<synchronous>, transform_indices = @transform_1, window_bounds = array<i64: 64, 1536>}, {transform_indices = @transform_2, window_bounds = array<i64: 8, 1536>}]} {
    %c0 = arith.constant 0 : index
    %c0_0 = arith.constant 0 : index
    %0 = vector.load %arg1[%c0, %c0_0] : memref<8x64xf32, #tpu.memory_space<vmem>>, vector<8x64xf32>
    %c0_1 = arith.constant 0 : index
    %c0_2 = arith.constant 0 : index
    %1 = vector.load %arg2[%c0_1, %c0_2] : memref<64x1536xf32, #tpu.memory_space<vmem>>, vector<64x1536xf32>
    %cst = arith.constant dense<0.000000e+00> : vector<8x1536xf32>
    %2 = tpu.matmul %0, %1, %cst {dimension_numbers = #tpu.dot_dimension_numbers<[1], [0], [0], [1], [0, 0, 1, 1], [], []>, precision = #tpu.contract_precision<fp32>} : vector<8x64xf32>, vector<64x1536xf32>, vector<8x1536xf32> -> vector<8x1536xf32>
    %c0_3 = arith.constant 0 : index
    %c0_4 = arith.constant 0 : index
    %3 = vector.load %arg3[%c0_3, %c0_4] : memref<8x1536xf32, #tpu.memory_space<vmem>>, vector<8x1536xf32>
    tpu.vector_store %arg3[%c0_3, %c0_4], %2 {strides = array<i32>} : memref<8x1536xf32, #tpu.memory_space<vmem>>, vector<8x1536xf32>,
    return
  }
  func.func @transform_0(%arg0: i32) -> (i32, i32) {
    %c0_i32 = arith.constant 0 : i32
    %c0_i32_0 = arith.constant 0 : i32
    return %arg0, %c0_i32 : i32, i32
  }
  func.func @transform_1(%arg0: i32) -> (i32, i32) {
    %c0_i32 = arith.constant 0 : i32
    %c0_i32_0 = arith.constant 0 : i32
    %c0_i32_1 = arith.constant 0 : i32
    return %c0_i32, %c0_i32_0 : i32, i32
  }
  func.func @transform_2(%arg0: i32) -> (i32, i32) {
    %c0_i32 = arith.constant 0 : i32
    %c0_i32_0 = arith.constant 0 : i32
    return %arg0, %c0_i32 : i32, i32
  }
}

</mosaic_0001>

<bundles_post_ra>
// kernel: tpu_custom_call.1
= control target key start
LH: loop header
LB: loop body
LE: loop exit
PB: predicated region body
PF: predicated region fallthrough
CT: control target
= control target key end

     0   :  { %7 = vsyncpa [#allocation3], 0  ;;  %s4654_s0 = inlined_call_operand.hbm [shape: f32[8,64], index: 0, kind: input, shape index: {}]   ;;  %s4655_s1 = inlined_call_operand.hbm [shape: f32[64,1536], index: 1, kind: input, shape index: {}]   ;;  %s4656_s2 = inlined_call_operand.hbm [shape: f32[8,1536], index: 2, kind: output, shape index: {}]  }
   0x1   :  { %8 = vsyncpa [#allocation6], 0 }
   0x2   :  { %9 = vsyncpa [#allocation4], 0  ;;  %s15_s11 = sshll.u32 %s4654_s0, 4  ;;  %s3100_s12 = smov [#allocation2]   ;;  %s16_s11 = int_to_ptr.hbm [resolvable:$true] %s15_s11 }
   0x3   :  { %s17_s13 = sshll.u32 %s3100_s12, 4  ;;  %s25_s16 = sshll.u32 %s4655_s1, 4  ;;  %s18_s13 = int_to_ptr.vmem [resolvable:$true] %s17_s13  ;;  %s26_s16 = int_to_ptr.hbm [resolvable:$true] %s25_s16 }
   0x4   :  { %20 = dma.hbm_to_vmem [thread:$0]  %s16_s11, 128, %s18_s13, [#allocation3]  }
   0x5   :  { %s3101_s17 = smov [#allocation5]   ;;  %s3102_s19 = smov 1536  }
   0x6   :  { %s27_s18 = sshll.u32 %s3101_s17, 4  ;;  %s3103_s20 = smov 96   ;;  %s28_s18 = int_to_ptr.vmem [resolvable:$true] %s27_s18 }
   0x7   :  { %33 = dma.hbm_to_vmem [thread:$0]  %s26_s16, 12288, %s28_s18, [#allocation6], %s3102_s19, %s3102_s19, %s3103_s20  }
   0x8   :  { %3094 = dma.done.wait [#allocation3], 128  }
   0x9   :  { %3095 = vsyncadd [#allocation3], 4294967168 }
   0xa   :  { %3096 = dma.done.wait [#allocation6], 12288  }
   0xb   :  { %3097 = vsyncadd [#allocation6], 4294955008  ;;  %v127_v0 = vld [vmem:[#allocation5 + $0x2a0] sm:$0xff]  ;;  %v128_v22 = vld [vmem:[#allocation5 + $0x2a8] sm:$0xff]  ;;  %vm139_vm0 = vcmask 523264   ;;  %s3104_s0 = smov [#allocation7]  }
   0xc   :  { %v115_v1 = vld [vmem:[#allocation5 + $0x240] sm:$0xff]  ;;  %v3126_v3 = vand.u32 4294901760, %v127_v0  ;;  %v116_v30 = vld [vmem:[#allocation5 + $0x248] sm:$0xff]  ;;  %v3185_v34 = vand.u32 4294901760, %v128_v22  ;;  %v42_v61 = vld [vmem:[#allocation2] sm:$0xff]  ;;  %s3004_s1 = sshll.u32 %s3104_s0, 4  ;;  %s3005_s1 = int_to_ptr.vmem [resolvable:$true] %s3004_s1 }
   0xd   :  { %v103_v2 = vld [vmem:[#allocation5 + $0x1e0] sm:$0xff]  ;;  %v3128_v4 = vand.u32 4294901760, %v115_v1  ;;  %v104_v37 = vld [vmem:[#allocation5 + $0x1e8] sm:$0xff]  ;;  %v3197_v42 = vand.u32 4294901760, %v116_v30  ;;  %s3006_s23 = sshll.u32 %s4656_s2, 4  ;;  %s3007_s23 = int_to_ptr.hbm [resolvable:$true] %s3006_s23 }
   0xe   :  { %v3130_v5 = vand.u32 4294901760, %v103_v2  ;;  %v91_v6 = vld [vmem:[#allocation5 + $0x180] sm:$0xff]  ;;  %152 = vmatpush.msra.mxu0 %v3126_v3  ;;  %v3140_v14 = vsub.f32 %v127_v0, %v3126_v3  ;;  %284 = vmatpush.msra.mxu3 %v3126_v3  ;;  %v92_v38 = vld [vmem:[#allocation5 + $0x188] sm:$0xff]  ;;  %v3208_v49 = vsub.f32 %v128_v22, %v3185_v34  ;;  %v3210_v50 = vand.u32 4294901760, %v104_v37 }
   0xf   :  { %v79_v7 = vld [vmem:[#allocation5 + $0x120] sm:$0xff]  ;;  %v3132_v9 = vand.u32 4294901760, %v91_v6  ;;  %v3143_v15 = vsub.f32 %v115_v1, %v3128_v4  ;;  %v80_v43 = vld [vmem:[#allocation5 + $0x128] sm:$0xff]  ;;  %v3213_v51 = vsub.f32 %v116_v30, %v3197_v42  ;;  %v3218_v53 = vand.u32 4294901760, %v92_v38 }
  0x10   :  { %v67_v8 = vld [vmem:[#allocation5 + $0xc0] sm:$0xff]  ;;  %v3134_v10 = vand.u32 4294901760, %v79_v7  ;;  %v3147_v16 = vsub.f32 %v103_v2, %v3130_v5  ;;  %247 = vmatpush.msra.mxu2 %v3140_v14  ;;  %154 = vmatpush.msra.mxu0 %v3128_v4  ;;  %v186_v23 = vand.u32 4294901760, %v3140_v14  ;;  %v68_v44 = vld [vmem:[#allocation5 + $0xc8] sm:$0xff]  ;;  %v3220_v54 = vand.u32 4294901760, %v80_v43 }
  0x11   :  { %v3136_v11 = vand.u32 4294901760, %v67_v8  ;;  %v55_v12 = vld [vmem:[#allocation5 + $0x60] sm:$0xff]  ;;  %v3152_v18 = vsub.f32 %v91_v6, %v3132_v9  ;;  %v192_v24 = vand.u32 4294901760, %v3143_v15  ;;  %286 = vmatpush.msra.mxu3 %v3128_v4  ;;  %v3222_v55 = vand.u32 4294901760, %v68_v44  ;;  %v56_v56 = vld [vmem:[#allocation5 + $0x68] sm:$0xff] }
  0x12   :  { %v43_v13 = vld [vmem:[#allocation5] sm:$0xff]  ;;  %v3149_v17 = vand.u32 4294901760, %v55_v12  ;;  %v3155_v19 = vsub.f32 %v79_v7, %v3134_v10  ;;  %v198_v25 = vand.u32 4294901760, %v3147_v16  ;;  %250 = vmatpush.msra.mxu2 %v3143_v15  ;;  %156 = vmatpush.msra.mxu0 %v3130_v5  ;;  %v187_v31 = vsub.f32 %v3140_v14, %v186_v23 }
  0x13   :  { %v3158_v20 = vsub.f32 %v67_v8, %v3136_v11  ;;  %v3160_v21 = vand.u32 4294901760, %v43_v13  ;;  %v204_v27 = vand.u32 4294901760, %v3152_v18  ;;  %v193_v32 = vsub.f32 %v3143_v15, %v192_v24  ;;  %288 = vmatpush.msra.mxu3 %v3130_v5 }
  0x14   :  { %v3168_v26 = vsub.f32 %v55_v12, %v3149_v17  ;;  %v210_v28 = vand.u32 4294901760, %v3155_v19  ;;  %v199_v33 = vsub.f32 %v3147_v16, %v198_v25  ;;  %v188_v39 = vand.u32 4294901760, %v187_v31  ;;  %253 = vmatpush.msra.mxu2 %v3147_v16  ;;  %158 = vmatpush.msra.mxu0 %v3132_v9  ;;  %v44_v31 = vld [vmem:[#allocation5 + $0x8] sm:$0xff] }
  0x15   :  { %v216_v29 = vand.u32 4294901760, %v3158_v20  ;;  %v205_v35 = vsub.f32 %v3152_v18, %v204_v27  ;;  %v3192_v36 = vsub.f32 %v43_v13, %v3160_v21  ;;  %v194_v40 = vand.u32 4294901760, %v193_v32  ;;  %290 = vmatpush.msra.mxu3 %v3132_v9 }
  0x16   :  { %v222_v41 = vand.u32 4294901760, %v3168_v26  ;;  %v200_v45 = vand.u32 4294901760, %v199_v33  ;;  %v211_v46 = vsub.f32 %v3155_v19, %v210_v28  ;;  %189 = vmatpush.msra.mxu1 %v188_v39  ;;  %256 = vmatpush.msra.mxu2 %v3152_v18  ;;  %v423_v58 = vand.u32 4294901760, %v3208_v49 }
  0x17   :  { %v217_v47 = vsub.f32 %v3158_v20, %v216_v29  ;;  %v206_v48 = vand.u32 4294901760, %v205_v35  ;;  %160 = vmatpush.msra.mxu0 %v3134_v10  ;;  %292 = vmatpush.msra.mxu3 %v3134_v10  ;;  %v228_v52 = vand.u32 4294901760, %v3192_v36  ;;  %v429_v59 = vand.u32 4294901760, %v3213_v51 }
  0x18   :  { %195 = vmatpush.msra.mxu1 %v194_v40  ;;  %259 = vmatpush.msra.mxu2 %v3155_v19  ;;  %v223_v57 = vsub.f32 %v3168_v26, %v222_v41  ;;  %v3231_v60 = vsub.f32 %v104_v37, %v3210_v50  ;;  %v212_v62 = vand.u32 4294901760, %v211_v46  ;;  %v3236_v63 = vsub.f32 %v92_v38, %v3218_v53  ;;  %v105_v19 = vld [vmem:[#allocation5 + $0x1f0] sm:$0xff] }
  0x19   :  { %162 = vmatpush.msra.mxu0 %v3136_v11  ;;  %294 = vmatpush.msra.mxu3 %v3136_v11  ;;  %v3239_v0 = vsub.f32 %v80_v43, %v3220_v54  ;;  %v3242_v1 = vsub.f32 %v68_v44, %v3222_v55  ;;  %v424_v2 = vsub.f32 %v3208_v49, %v423_v58  ;;  %v3252_v8 = vand.u32 4294901760, %v56_v56 }
  0x1a   :  { %201 = vmatpush.msra.mxu1 %v200_v45  ;;  %262 = vmatpush.msra.mxu2 %v3158_v20  ;;  %v430_v6 = vsub.f32 %v3213_v51, %v429_v59  ;;  %v435_v7 = vand.u32 4294901760, %v3231_v60  ;;  %v218_v12 = vand.u32 4294901760, %v217_v47  ;;  %v229_v13 = vsub.f32 %v3192_v36, %v228_v52 }
  0x1b   :  { %164 = vmatpush.msra.mxu0 %v3149_v17  ;;  %296 = vmatpush.msra.mxu3 %v3149_v17  ;;  %v441_v22 = vand.u32 4294901760, %v3236_v63  ;;  %v141_v30 = vsel %vm139_vm0, %v42_v61, 0  ;;  %v425_v32 = vand.u32 4294901760, %v424_v2  ;;  %v447_v35 = vand.u32 4294901760, %v3239_v0 }
  0x1c   :  { %207 = vmatpush.msra.mxu1 %v206_v48  ;;  %265 = vmatpush.msra.mxu2 %v3168_v26  ;;  %v436_v33 = vsub.f32 %v3231_v60, %v435_v7  ;;  %v3266_v37 = vand.u32 4294901760, %v141_v30  ;;  %v224_v38 = vand.u32 4294901760, %v223_v57  ;;  %v453_v39 = vand.u32 4294901760, %v3242_v1 }
  0x1d   :  { %166 = vmatpush.msra.mxu0 %v3160_v21  ;;  %298 = vmatpush.msra.mxu3 %v3160_v21  ;;  %v431_v40 = vand.u32 4294901760, %v430_v6  ;;  %v442_v43 = vsub.f32 %v3236_v63, %v441_v22  ;;  %v3275_v44 = vand.u32 4294901760, %v44_v31  ;;  %v3278_v45 = vsub.f32 %v56_v56, %v3252_v8 }
  0x1e   :  { %213 = vmatpush.msra.mxu1 %v212_v62  ;;  %268 = vmatpush.msra.mxu2 %v3192_v36  ;;  %v3284_v46 = vsub.f32 %v141_v30, %v3266_v37  ;;  %v230_v47 = vand.u32 4294901760, %v229_v13  ;;  %v437_v48 = vand.u32 4294901760, %v436_v33  ;;  %v448_v57 = vsub.f32 %v3239_v0, %v447_v35  ;;  %v69_v36 = vld [vmem:[#allocation5 + $0xd0] sm:$0xff] }
  0x1f   :  { %317 = vmatpush.msrb.mxu0 %v186_v23  ;;  %426 = vmatpush.msrb.mxu3 %v425_v32  ;;  %v459_v61 = vand.u32 4294901760, %v3278_v45  ;;  %v443_v14 = vand.u32 4294901760, %v442_v43  ;;  %v454_v23 = vsub.f32 %v3242_v1, %v453_v39  ;;  %v3297_v56 = vsub.f32 %v44_v31, %v3275_v44  ;;  %v106_v31 = vld [vmem:[#allocation5 + $0x1f8] sm:$0xff] }
  0x20   :  { %389 = vmatpush.msrb.mxu2 %v3185_v34  ;;  %219 = vmatpush.msra.mxu1 %v218_v12  ;;  %v3303_v15 = vand.u32 4294901760, %v3284_v46  ;;  %v3369_v26 = vand.u32 4294901760, %v105_v19  ;;  %v118_v12 = vld [vmem:[#allocation5 + $0x258] sm:$0xff] }
  0x21   :  { %321 = vmatpush.msrb.mxu0 %v192_v24  ;;  %432 = vmatpush.msrb.mxu3 %v431_v40  ;;  %v449_v24 = vand.u32 4294901760, %v448_v57  ;;  %v460_v62 = vsub.f32 %v3278_v45, %v459_v61  ;;  %v455_v16 = vand.u32 4294901760, %v454_v23  ;;  %v3445_v33 = vand.u32 4294901760, %v118_v12  ;;  %v94_v40 = vld [vmem:[#allocation5 + $0x198] sm:$0xff] }
  0x22   :  { %391 = vmatpush.msrb.mxu2 %v3197_v42  ;;  %225 = vmatpush.msra.mxu1 %v224_v38  ;;  %v170_v2 = vsub.f32 %v3284_v46, %v3303_v15 }
  0x23   :  { %325 = vmatpush.msrb.mxu0 %v198_v25  ;;  %438 = vmatpush.msrb.mxu3 %v437_v48  ;;  %v465_v25 = vand.u32 4294901760, %v3297_v56  ;;  %v82_v48 = vld [vmem:[#allocation5 + $0x138] sm:$0xff] }
  0x24   :  { %393 = vmatpush.msrb.mxu2 %v3210_v50  ;;  %231 = vmatpush.msra.mxu1 %v230_v47  ;;  %v3329_v18 = vand.u32 4294901760, %v170_v2  ;;  %v3486_v2 = vand.u32 4294901760, %v82_v48 }
  0x25   :  { %329 = vmatpush.msrb.mxu0 %v204_v27  ;;  %444 = vmatpush.msrb.mxu3 %v443_v14  ;;  %v3472_v14 = vand.u32 4294901760, %v94_v40 }
  0x26   :  { %360 = vmatpush.msrb.mxu1 %v3126_v3  ;;  %395 = vmatpush.msrb.mxu2 %v3218_v53  ;;  %v461_v3 = vand.u32 4294901760, %v460_v62  ;;  %v70_v62 = vld [vmem:[#allocation5 + $0xd8] sm:$0xff] }
  0x27   :  { %333 = vmatpush.msrb.mxu0 %v210_v28  ;;  %450 = vmatpush.msrb.mxu3 %v449_v24  ;;  %v81_v28 = vld [vmem:[#allocation5 + $0x130] sm:$0xff] }
  0x28   :  { %362 = vmatpush.msrb.mxu1 %v3128_v4  ;;  %397 = vmatpush.msrb.mxu2 %v3220_v54  ;;  %v466_v4 = vsub.f32 %v3297_v56, %v465_v25 }
  0x29   :  { %337 = vmatpush.msrb.mxu0 %v216_v29  ;;  %456 = vmatpush.msrb.mxu3 %v455_v16 }
  0x2a   :  { %364 = vmatpush.msrb.mxu1 %v3130_v5  ;;  %399 = vmatpush.msrb.mxu2 %v3222_v55  ;;  %v467_v5 = vand.u32 4294901760, %v466_v4 }
  0x2b   :  { %341 = vmatpush.msrb.mxu0 %v222_v41  ;;  %462 = vmatpush.msrb.mxu3 %v461_v3  ;;  %v3388_v41 = vsub.f32 %v105_v19, %v3369_v26  ;;  %v58_v19 = vld [vmem:[#allocation5 + $0x78] sm:$0xff] }
  0x2c   :  { %366 = vmatpush.msrb.mxu1 %v3132_v9  ;;  %401 = vmatpush.msrb.mxu2 %v3252_v8  ;;  %v129_v9 = vld [vmem:[#allocation5 + $0x2b0] sm:$0xff] }
  0x2d   :  { %271 = vmatmul.f32.vlgmr.msra.gmra.mxu2 %v3284_v46  ;;  %345 = vmatpush.msrb.mxu0 %v228_v52  ;;  %v3404_v52 = vand.u32 4294901760, %v69_v36 }
  0x2e   :  { %368 = vmatpush.msrb.mxu1 %v3134_v10  ;;  %403 = vmatpush.msrb.mxu2 %v3275_v44  ;;  %v3348_v10 = vand.u32 4294901760, %v129_v9 }
  0x2f   :  { %172 = vmatmul.f32.vlgmr.msra.gmra.mxu0 %v3329_v18  ;;  %302 = vmatmul.f32.vlgmr.msra.gmra.mxu3 %v3303_v15  ;;  %v3426_v6 = vsub.f32 %v69_v36, %v3404_v52 }
  0x30   :  { %370 = vmatpush.msrb.mxu1 %v3136_v11  ;;  %484 = vmatpush.msra.mxu0 %v3208_v49  ;;  %v117_v11 = vld [vmem:[#allocation5 + $0x250] sm:$0xff]  ;;  %v3362_v20 = vsub.f32 %v129_v9, %v3348_v10  ;;  %v3496_v9 = vsub.f32 %v94_v40, %v3472_v14 }
  0x31   :  { %554 = vmatpush.msra.mxu2 %v423_v58  ;;  %468 = vmatpush.msrb.mxu3 %v467_v5  ;;  %v672_v58 = vand.u32 4294901760, %v3388_v41  ;;  %v690_v38 = vand.u32 4294901760, %v3426_v6 }
  0x32   :  { %372 = vmatpush.msrb.mxu1 %v3149_v17  ;;  %487 = vmatpush.msra.mxu0 %v3213_v51  ;;  %v3357_v17 = vand.u32 4294901760, %v117_v11  ;;  %v660_v29 = vand.u32 4294901760, %v3362_v20 }
  0x33   :  { %233 = vmatmul.f32.vlgmr.msra.gmra.mxu1 %v3266_v37  ;;  %558 = vmatpush.msra.mxu2 %v429_v59 }
  0x34   :  { %597 = vmatpush.msra.mxu3 %v3185_v34  ;;  %374 = vmatpush.msrb.mxu1 %v3160_v21  ;;  %v93_v21 = vld [vmem:[#allocation5 + $0x190] sm:$0xff]  ;;  %v3375_v27 = vsub.f32 %v117_v11, %v3357_v17  ;;  %v3498_v11 = vand.u32 4294901760, %v70_v62 }
  0x35   :  { %490 = vmatpush.msra.mxu0 %v3231_v60  ;;  %562 = vmatpush.msra.mxu2 %v435_v7  ;;  %v45_v60 = vld [vmem:[#allocation5 + $0x10] sm:$0xff] }
  0x36   :  { %521 = vmatpush.msra.mxu1 %v3185_v34  ;;  %599 = vmatpush.msra.mxu3 %v3197_v42  ;;  %v3380_v34 = vand.u32 4294901760, %v93_v21  ;;  %v666_v49 = vand.u32 4294901760, %v3375_v27  ;;  %v3432_v13 = vand.u32 4294901760, %v45_v60 }
  0x37   :  { %493 = vmatpush.msra.mxu0 %v3236_v63  ;;  %566 = vmatpush.msra.mxu2 %v441_v22  ;;  %v673_v22 = vsub.f32 %v3388_v41, %v672_v58 }
  0x38   :  { %523 = vmatpush.msra.mxu1 %v3197_v42  ;;  %601 = vmatpush.msra.mxu3 %v3210_v50  ;;  %v3390_v42 = vand.u32 4294901760, %v81_v28  ;;  %v3402_v51 = vsub.f32 %v93_v21, %v3380_v34  ;;  %v667_v63 = vsub.f32 %v3375_v27, %v666_v49  ;;  %v3458_v43 = vsub.f32 %v45_v60, %v3432_v13  ;;  %v46_v60 = vld [vmem:[#allocation5 + $0x18] sm:$0xff] }
  0x39   :  { %347 = vmatmul.f32.vlgmr.msrb.gmra.mxu0 %v3266_v37  ;;  %570 = vmatpush.msra.mxu2 %v447_v35 }
  0x3a   :  { %525 = vmatpush.msra.mxu1 %v3210_v50  ;;  %496 = vmatpush.msra.mxu0 %v3239_v0  ;;  %v661_v50 = vsub.f32 %v3362_v20, %v660_v29  ;;  %v3413_v59 = vsub.f32 %v81_v28, %v3390_v42  ;;  %v702_v16 = vand.u32 4294901760, %v3458_v43 }
  0x3b   :  { %603 = vmatpush.msra.mxu3 %v3218_v53  ;;  %376 = vmatmul.f32.vlgmr.msrb.gmra.mxu1 %v3266_v37 }
  0x3c   :  { %499 = vmatpush.msra.mxu0 %v3242_v1  ;;  %527 = vmatpush.msra.mxu1 %v3218_v53  ;;  %v57_v53 = vld [vmem:[#allocation5 + $0x70] sm:$0xff]  ;;  %v678_v1 = vand.u32 4294901760, %v3402_v51  ;;  %v684_v30 = vand.u32 4294901760, %v3413_v59  ;;  %v703_v36 = vsub.f32 %v3458_v43, %v702_v16 }
  0x3d   :  { %574 = vmatpush.msra.mxu2 %v453_v39  ;;  %605 = vmatpush.msra.mxu3 %v3220_v54  ;;  %v3420_v0 = vand.u32 4294901760, %v57_v53 }
  0x3e   :  { %502 = vmatpush.msra.mxu0 %v3278_v45  ;;  %529 = vmatpush.msra.mxu1 %v3220_v54  ;;  %v130_v54 = vld [vmem:[#allocation5 + $0x2b8] sm:$0xff]  ;;  %v679_v35 = vsub.f32 %v3402_v51, %v678_v1  ;;  %v674_v45 = vand.u32 4294901760, %v673_v22  ;;  %v685_v47 = vsub.f32 %v3413_v59, %v684_v30  ;;  %v3523_v22 = vsub.f32 %v70_v62, %v3498_v11 }
  0x3f   :  { %578 = vmatpush.msra.mxu2 %v459_v61  ;;  %607 = vmatpush.msra.mxu3 %v3222_v55  ;;  %v3428_v7 = vand.u32 4294901760, %v130_v54  ;;  %v3443_v32 = vsub.f32 %v57_v53, %v3420_v0  ;;  %v3470_v61 = vsub.f32 %v118_v12, %v3445_v33  ;;  %v3511_v53 = vsub.f32 %v82_v48, %v3486_v2 }
  0x40   :  { %409 = vmatmul.f32.vlgmr.msrb.gmra.mxu2 %v3329_v18  ;;  %505 = vmatpush.msra.mxu0 %v3297_v56  ;;  %v680_v23 = vand.u32 4294901760, %v679_v35  ;;  %v691_v56 = vsub.f32 %v3426_v6, %v690_v38  ;;  %v686_v3 = vand.u32 4294901760, %v685_v47  ;;  %v915_v12 = vand.u32 4294901760, %v3496_v9 }
  0x41   :  { %531 = vmatpush.msra.mxu1 %v3222_v55  ;;  %582 = vmatpush.msra.mxu2 %v465_v25  ;;  %v662_v55 = vand.u32 4294901760, %v661_v50  ;;  %v3453_v39 = vsub.f32 %v130_v54, %v3428_v7  ;;  %v696_v57 = vand.u32 4294901760, %v3443_v32  ;;  %v903_v5 = vand.u32 4294901760, %v3470_v61 }
  0x42   :  { %609 = vmatpush.msra.mxu3 %v3252_v8  ;;  %626 = vmatpush.msrb.mxu0 %v3348_v10  ;;  %v692_v21 = vand.u32 4294901760, %v691_v56  ;;  %v3514_v54 = vand.u32 4294901760, %v58_v19  ;;  %v921_v40 = vand.u32 4294901760, %v3511_v53  ;;  %v927_v56 = vand.u32 4294901760, %v3523_v22 }
  0x43   :  { %470 = vmatmul.f32.vlgmr.msrb.gmra.mxu3 %v3266_v37  ;;  %721 = vmatpush.msrb.mxu2 %v3362_v20  ;;  %v897_v24 = vand.u32 4294901760, %v3453_v39  ;;  %v697_v4 = vsub.f32 %v3443_v32, %v696_v57 }
  0x44   :  { %533 = vmatpush.msra.mxu1 %v3252_v8  ;;  %611 = vmatpush.msra.mxu3 %v3275_v44  ;;  %v668_v8 = vand.u32 4294901760, %v667_v63  ;;  %v3538_v47 = vsub.f32 %v58_v19, %v3514_v54 }
  0x45   :  { %628 = vmatpush.msrb.mxu0 %v3357_v17  ;;  %724 = vmatpush.msrb.mxu2 %v3375_v27  ;;  %v898_v28 = vsub.f32 %v3453_v39, %v897_v24  ;;  %v698_v63 = vand.u32 4294901760, %v697_v4 }
  0x46   :  { %758 = vmatpush.msrb.mxu3 %v3348_v10  ;;  %535 = vmatpush.msra.mxu1 %v3275_v44  ;;  %v3460_v44 = vand.u32 4294901760, %v106_v31  ;;  %v933_v27 = vand.u32 4294901760, %v3538_v47 }
  0x47   :  { %630 = vmatpush.msrb.mxu0 %v3369_v26  ;;  %727 = vmatpush.msrb.mxu2 %v3388_v41 }
  0x48   :  { %663 = vmatpush.msrb.mxu1 %v662_v55  ;;  %760 = vmatpush.msrb.mxu3 %v3357_v17  ;;  %v3484_v25 = vsub.f32 %v106_v31, %v3460_v44  ;;  %v904_v55 = vsub.f32 %v3470_v61, %v903_v5  ;;  %v899_v31 = vand.u32 4294901760, %v898_v28 }
  0x49   :  { %584 = vmatmul.f32.vlgmr.msra.gmra.mxu2 %v3266_v37  ;;  %632 = vmatpush.msrb.mxu0 %v3380_v34 }
  0x4a   :  { %669 = vmatpush.msrb.mxu1 %v668_v8  ;;  %730 = vmatpush.msrb.mxu2 %v3402_v51  ;;  %v909_v50 = vand.u32 4294901760, %v3484_v25  ;;  %v704_v8 = vand.u32 4294901760, %v703_v36  ;;  %v905_v48 = vand.u32 4294901760, %v904_v55  ;;  %v108_v55 = vld [vmem:[#allocation5 + $0x208] sm:$0xff] }
  0x4b   :  { %762 = vmatpush.msrb.mxu3 %v3369_v26  ;;  %508 = vmatmul.f32.vlgmr.msra.gmra.mxu0 %v3284_v46 }
  0x4c   :  { %613 = vmatmul.f32.vlgmr.msra.gmra.mxu3 %v3266_v37  ;;  %634 = vmatpush.msrb.mxu0 %v3390_v42  ;;  %v910_v35 = vsub.f32 %v3484_v25, %v909_v50 }
  0x4d   :  { %675 = vmatpush.msrb.mxu1 %v674_v45  ;;  %733 = vmatpush.msrb.mxu2 %v3413_v59  ;;  %v3532_v45 = vand.u32 4294901760, %v46_v60  ;;  %v119_v59 = vld [vmem:[#allocation5 + $0x260] sm:$0xff] }
  0x4e   :  { %764 = vmatpush.msrb.mxu3 %v3380_v34  ;;  %539 = vmatmul.f32.vlgmr.msra.gmra.mxu1 %v3303_v15  ;;  %v911_v20 = vand.u32 4294901760, %v910_v35 }
  0x4f   :  { %636 = vmatpush.msrb.mxu0 %v3404_v52  ;;  %681 = vmatpush.msrb.mxu1 %v680_v23  ;;  %v916_v23 = vsub.f32 %v3496_v9, %v915_v12  ;;  %v3552_v62 = vsub.f32 %v46_v60, %v3532_v45 }
  0x50   :  { %736 = vmatpush.msrb.mxu2 %v3426_v6  ;;  %766 = vmatpush.msrb.mxu3 %v3390_v42 }
  0x51   :  { %638 = vmatpush.msrb.mxu0 %v3420_v0  ;;  %687 = vmatpush.msrb.mxu1 %v686_v3  ;;  %v928_v3 = vsub.f32 %v3523_v22, %v927_v56 }
  0x52   :  { %739 = vmatpush.msrb.mxu2 %v3443_v32  ;;  %768 = vmatpush.msrb.mxu3 %v3404_v52  ;;  %v83_v32 = vld [vmem:[#allocation5 + $0x140] sm:$0xff] }
  0x53   :  { %640 = vmatpush.msrb.mxu0 %v3432_v13  ;;  %693 = vmatpush.msrb.mxu1 %v692_v21  ;;  %v929_v51 = vand.u32 4294901760, %v928_v3 }
  0x54   :  { %742 = vmatpush.msrb.mxu2 %v3458_v43  ;;  %770 = vmatpush.msrb.mxu3 %v3420_v0 }
  0x55   :  { %791 = vmatpush.msra.mxu0 %v660_v29  ;;  %699 = vmatpush.msrb.mxu1 %v698_v63  ;;  %v922_v29 = vsub.f32 %v3511_v53, %v921_v40 }
  0x56   :  { %863 = vmatpush.msra.mxu2 %v3428_v7  ;;  %772 = vmatpush.msrb.mxu3 %v3432_v13 }
  0x57   :  { %795 = vmatpush.msra.mxu0 %v666_v49  ;;  %705 = vmatpush.msrb.mxu1 %v704_v8  ;;  %v917_v49 = vand.u32 4294901760, %v916_v23  ;;  %v923_v41 = vand.u32 4294901760, %v922_v29 }
  0x58   :  { %865 = vmatpush.msra.mxu2 %v3445_v33  ;;  %900 = vmatpush.msra.mxu3 %v899_v31 }
  0x59   :  { %799 = vmatpush.msra.mxu0 %v672_v58  ;;  %834 = vmatpush.msra.mxu1 %v3348_v10  ;;  %v939_v10 = vand.u32 4294901760, %v3552_v62  ;;  %v934_v58 = vsub.f32 %v3538_v47, %v933_v27 }
  0x5a   :  { %867 = vmatpush.msra.mxu2 %v3460_v44  ;;  %906 = vmatpush.msra.mxu3 %v905_v48 }
  0x5b   :  { %803 = vmatpush.msra.mxu0 %v678_v1  ;;  %836 = vmatpush.msra.mxu1 %v3357_v17  ;;  %v940_v17 = vsub.f32 %v3552_v62, %v939_v10  ;;  %v107_v1 = vld [vmem:[#allocation5 + $0x200] sm:$0xff] }
  0x5c   :  { %869 = vmatpush.msra.mxu2 %v3472_v14  ;;  %912 = vmatpush.msra.mxu3 %v911_v20 }
  0x5d   :  { %807 = vmatpush.msra.mxu0 %v684_v30  ;;  %838 = vmatpush.msra.mxu1 %v3369_v26  ;;  %v935_v26 = vand.u32 4294901760, %v934_v58 }
  0x5e   :  { %871 = vmatpush.msra.mxu2 %v3486_v2  ;;  %918 = vmatpush.msra.mxu3 %v917_v49 }
  0x5f   :  { %811 = vmatpush.msra.mxu0 %v690_v38  ;;  %840 = vmatpush.msra.mxu1 %v3380_v34  ;;  %v941_v34 = vand.u32 4294901760, %v940_v17 }
  0x60   :  { %873 = vmatpush.msra.mxu2 %v3498_v11  ;;  %924 = vmatpush.msra.mxu3 %v923_v41  ;;  %v72_v41 = vld [vmem:[#allocation5 + $0xe8] sm:$0xff] }
  0x61   :  { %815 = vmatpush.msra.mxu0 %v696_v57  ;;  %842 = vmatpush.msra.mxu1 %v3390_v42  ;;  %v131_v42 = vld [vmem:[#allocation5 + $0x2c0] sm:$0xff] }
  0x62   :  { %875 = vmatpush.msra.mxu2 %v3514_v54  ;;  %930 = vmatpush.msra.mxu3 %v929_v51 }
  0x63   :  { %745 = vmatmul.f32.vlgmr.msrb.gmra.mxu2 %v3284_v46  ;;  %819 = vmatpush.msra.mxu0 %v702_v16  ;;  %v59_v16 = vld [vmem:[#allocation5 + $0x80] sm:$0xff] }
  0x64   :  { %844 = vmatpush.msra.mxu1 %v3404_v52  ;;  %877 = vmatpush.msra.mxu2 %v3532_v45  ;;  %v3600_v52 = vand.u32 4294901760, %v131_v42  ;;  %v3672_v19 = vand.u32 4294901760, %v59_v16 }
  0x65   :  { %936 = vmatpush.msra.mxu3 %v935_v26  ;;  %646 = vmatmul.f32.vlgmr.msrb.gmra.mxu0 %v3329_v18 }
  0x66   :  { %776 = vmatmul.f32.vlgmr.msrb.gmra.mxu3 %v3303_v15  ;;  %958 = vmatpush.msrb.mxu0 %v3453_v39  ;;  %v3614_v6 = vsub.f32 %v131_v42, %v3600_v52  ;;  %v71_v39 = vld [vmem:[#allocation5 + $0xe0] sm:$0xff] }
  0x67   :  { %1028 = vmatpush.msrb.mxu2 %v897_v24  ;;  %846 = vmatpush.msra.mxu1 %v3420_v0  ;;  %v3609_v0 = vand.u32 4294901760, %v119_v59  ;;  %v3656_v24 = vand.u32 4294901760, %v71_v39 }
  0x68   :  { %942 = vmatpush.msra.mxu3 %v941_v34  ;;  %707 = vmatmul.f32.vlgmr.msrb.gmra.mxu1 %v3266_v37 }
  0x69   :  { %961 = vmatpush.msrb.mxu0 %v3470_v61  ;;  %1032 = vmatpush.msrb.mxu2 %v903_v5  ;;  %v3627_v30 = vsub.f32 %v119_v59, %v3609_v0  ;;  %v47_v5 = vld [vmem:[#allocation5 + $0x20] sm:$0xff]  ;;  %v3678_v28 = vsub.f32 %v71_v39, %v3656_v24  ;;  %v3750_v59 = vand.u32 4294901760, %v72_v41 }
  0x6a   :  { %1071 = vmatpush.msrb.mxu3 %v3428_v7  ;;  %848 = vmatpush.msra.mxu1 %v3432_v13  ;;  %v3621_v13 = vand.u32 4294901760, %v107_v1 }
  0x6b   :  { %964 = vmatpush.msrb.mxu0 %v3484_v25  ;;  %1036 = vmatpush.msrb.mxu2 %v909_v50  ;;  %v1140_v57 = vand.u32 4294901760, %v3627_v30  ;;  %v132_v25 = vld [vmem:[#allocation5 + $0x2c8] sm:$0xff]  ;;  %v1164_v8 = vand.u32 4294901760, %v3678_v28 }
  0x6c   :  { %995 = vmatpush.msrb.mxu1 %v3428_v7  ;;  %1073 = vmatpush.msrb.mxu3 %v3445_v33  ;;  %v95_v7 = vld [vmem:[#allocation5 + $0x1a0] sm:$0xff]  ;;  %v3640_v43 = vsub.f32 %v107_v1, %v3621_v13  ;;  %v3680_v36 = vand.u32 4294901760, %v132_v25  ;;  %v120_v50 = vld [vmem:[#allocation5 + $0x268] sm:$0xff] }
  0x6d   :  { %967 = vmatpush.msrb.mxu0 %v3496_v9  ;;  %1040 = vmatpush.msrb.mxu2 %v915_v12  ;;  %v3632_v38 = vand.u32 4294901760, %v95_v7  ;;  %v1141_v9 = vsub.f32 %v3627_v30, %v1140_v57  ;;  %v3695_v12 = vsub.f32 %v59_v16, %v3672_v19  ;;  %v1165_v49 = vsub.f32 %v3678_v28, %v1164_v8  ;;  %v60_v1 = vld [vmem:[#allocation5 + $0x88] sm:$0xff] }
  0x6e   :  { %997 = vmatpush.msrb.mxu1 %v3445_v33  ;;  %1075 = vmatpush.msrb.mxu3 %v3460_v44  ;;  %v1134_v33 = vand.u32 4294901760, %v3614_v6  ;;  %v3705_v35 = vsub.f32 %v132_v25, %v3680_v36  ;;  %v3766_v25 = vand.u32 4294901760, %v60_v1 }
  0x6f   :  { %821 = vmatmul.f32.vlgmr.msra.gmra.mxu0 %v3266_v37  ;;  %1044 = vmatpush.msrb.mxu2 %v921_v40  ;;  %v96_v40 = vld [vmem:[#allocation5 + $0x1a8] sm:$0xff]  ;;  %v1170_v20 = vand.u32 4294901760, %v3695_v12 }
  0x70   :  { %999 = vmatpush.msrb.mxu1 %v3460_v44  ;;  %970 = vmatpush.msrb.mxu0 %v3511_v53  ;;  %v3642_v44 = vand.u32 4294901760, %v83_v32  ;;  %v1135_v61 = vsub.f32 %v3614_v6, %v1134_v33  ;;  %v3684_v53 = vand.u32 4294901760, %v47_v5  ;;  %v1371_v3 = vand.u32 4294901760, %v3705_v35 }
  0x71   :  { %1077 = vmatpush.msrb.mxu3 %v3472_v14  ;;  %850 = vmatmul.f32.vlgmr.msra.gmra.mxu1 %v3266_v37  ;;  %v1171_v26 = vsub.f32 %v3695_v12, %v1170_v20 }
  0x72   :  { %973 = vmatpush.msrb.mxu0 %v3523_v22  ;;  %1001 = vmatpush.msrb.mxu1 %v3472_v14  ;;  %v3654_v14 = vsub.f32 %v95_v7, %v3632_v38  ;;  %v3665_v4 = vsub.f32 %v83_v32, %v3642_v44  ;;  %v3697_v22 = vand.u32 4294901760, %v120_v50  ;;  %v1166_v7 = vand.u32 4294901760, %v1165_v49 }
  0x73   :  { %1048 = vmatpush.msrb.mxu2 %v927_v56  ;;  %1079 = vmatpush.msrb.mxu3 %v3486_v2  ;;  %v84_v56 = vld [vmem:[#allocation5 + $0x148] sm:$0xff]  ;;  %v1372_v32 = vsub.f32 %v3705_v35, %v1371_v3 }
  0x74   :  { %976 = vmatpush.msrb.mxu0 %v3538_v47  ;;  %1003 = vmatpush.msrb.mxu1 %v3486_v2  ;;  %v1146_v2 = vand.u32 4294901760, %v3640_v43  ;;  %v1152_v21 = vand.u32 4294901760, %v3654_v14  ;;  %v1158_v63 = vand.u32 4294901760, %v3665_v4  ;;  %v3712_v47 = vand.u32 4294901760, %v108_v55 }
  0x75   :  { %1052 = vmatpush.msrb.mxu2 %v933_v27  ;;  %1081 = vmatpush.msrb.mxu3 %v3498_v11  ;;  %v3722_v29 = vsub.f32 %v120_v50, %v3697_v22  ;;  %v3738_v51 = vand.u32 4294901760, %v84_v56 }
  0x76   :  { %883 = vmatmul.f32.vlgmr.msra.gmra.mxu2 %v3329_v18  ;;  %979 = vmatpush.msrb.mxu0 %v3552_v62  ;;  %v1147_v60 = vsub.f32 %v3640_v43, %v1146_v2  ;;  %v1153_v31 = vsub.f32 %v3654_v14, %v1152_v21  ;;  %v1159_v23 = vsub.f32 %v3665_v4, %v1158_v63  ;;  %v3724_v62 = vand.u32 4294901760, %v96_v40 }
  0x77   :  { %1005 = vmatpush.msrb.mxu1 %v3498_v11  ;;  %1056 = vmatpush.msrb.mxu2 %v939_v10  ;;  %v1136_v11 = vand.u32 4294901760, %v1135_v61  ;;  %v3736_v58 = vsub.f32 %v108_v55, %v3712_v47  ;;  %v1377_v34 = vand.u32 4294901760, %v3722_v29  ;;  %v3763_v16 = vsub.f32 %v84_v56, %v3738_v51 }
  0x78   :  { %1083 = vmatpush.msrb.mxu3 %v3514_v54  ;;  %1100 = vmatpush.msra.mxu0 %v3600_v52  ;;  %v1148_v48 = vand.u32 4294901760, %v1147_v60  ;;  %v1154_v27 = vand.u32 4294901760, %v1153_v31  ;;  %v1160_v17 = vand.u32 4294901760, %v1159_v23  ;;  %v3748_v42 = vsub.f32 %v96_v40, %v3724_v62 }
  0x79   :  { %944 = vmatmul.f32.vlgmr.msra.gmra.mxu3 %v3266_v37  ;;  %1195 = vmatpush.msra.mxu2 %v3614_v6  ;;  %v1383_v61 = vand.u32 4294901760, %v3736_v58  ;;  %v3775_v60 = vsub.f32 %v72_v41, %v3750_v59  ;;  %v1373_v55 = vand.u32 4294901760, %v1372_v32  ;;  %v1395_v40 = vand.u32 4294901760, %v3763_v16 }
  0x7a   :  { %1007 = vmatpush.msrb.mxu1 %v3514_v54  ;;  %1085 = vmatpush.msrb.mxu3 %v3532_v45  ;;  %v1142_v54 = vand.u32 4294901760, %v1141_v9  ;;  %v1172_v9 = vand.u32 4294901760, %v1171_v26  ;;  %v1389_v50 = vand.u32 4294901760, %v3748_v42  ;;  %v3790_v23 = vsub.f32 %v60_v1, %v3766_v25 }
  0x7b   :  { %1102 = vmatpush.msra.mxu0 %v3609_v0  ;;  %1198 = vmatpush.msra.mxu2 %v3627_v30  ;;  %v1384_v31 = vsub.f32 %v3736_v58, %v1383_v61  ;;  %v1401_v49 = vand.u32 4294901760, %v3775_v60 }
  0x7c   :  { %1232 = vmatpush.msra.mxu3 %v3600_v52  ;;  %1009 = vmatpush.msrb.mxu1 %v3532_v45  ;;  %v3710_v45 = vsub.f32 %v47_v5, %v3684_v53  ;;  %v48_v5 = vld [vmem:[#allocation5 + $0x28] sm:$0xff]  ;;  %v1407_v30 = vand.u32 4294901760, %v3790_v23 }
  0x7d   :  { %1104 = vmatpush.msra.mxu0 %v3621_v13  ;;  %1201 = vmatpush.msra.mxu2 %v3640_v43  ;;  %v1385_v6 = vand.u32 4294901760, %v1384_v31 }
  0x7e   :  { %1137 = vmatpush.msra.mxu1 %v1136_v11  ;;  %1234 = vmatpush.msra.mxu3 %v3609_v0  ;;  %v1176_v10 = vand.u32 4294901760, %v3710_v45  ;;  %v1378_v11 = vsub.f32 %v3722_v29, %v1377_v34 }
  0x7f   :  { %1058 = vmatmul.f32.vlgmr.msrb.gmra.mxu2 %v3266_v37  ;;  %1106 = vmatpush.msra.mxu0 %v3632_v38 }
  0x80   :  { %1143 = vmatpush.msra.mxu1 %v1142_v54  ;;  %1204 = vmatpush.msra.mxu2 %v3654_v14  ;;  %v1177_v39 = vsub.f32 %v3710_v45, %v1176_v10  ;;  %v1379_v56 = vand.u32 4294901760, %v1378_v11 }
  0x81   :  { %1236 = vmatpush.msra.mxu3 %v3621_v13  ;;  %982 = vmatmul.f32.vlgmr.msrb.gmra.mxu0 %v3284_v46 }
  0x82   :  { %1087 = vmatmul.f32.vlgmr.msrb.gmra.mxu3 %v3266_v37  ;;  %1108 = vmatpush.msra.mxu0 %v3642_v44  ;;  %v1178_v54 = vand.u32 4294901760, %v1177_v39 }
  0x83   :  { %1149 = vmatpush.msra.mxu1 %v1148_v48  ;;  %1207 = vmatpush.msra.mxu2 %v3665_v4  ;;  %v3784_v48 = vand.u32 4294901760, %v48_v5  ;;  %v121_v4 = vld [vmem:[#allocation5 + $0x270] sm:$0xff] }
  0x84   :  { %1238 = vmatpush.msra.mxu3 %v3632_v38  ;;  %1013 = vmatmul.f32.vlgmr.msrb.gmra.mxu1 %v3303_v15 }
  0x85   :  { %1110 = vmatpush.msra.mxu0 %v3656_v24  ;;  %1155 = vmatpush.msra.mxu1 %v1154_v27  ;;  %v1390_v27 = vsub.f32 %v3748_v42, %v1389_v50  ;;  %v3804_v41 = vsub.f32 %v48_v5, %v3784_v48 }
  0x86   :  { %1210 = vmatpush.msra.mxu2 %v3678_v28  ;;  %1240 = vmatpush.msra.mxu3 %v3642_v44 }
  0x87   :  { %1112 = vmatpush.msra.mxu0 %v3672_v19  ;;  %1161 = vmatpush.msra.mxu1 %v1160_v17  ;;  %v1402_v17 = vsub.f32 %v3775_v60, %v1401_v49 }
  0x88   :  { %1213 = vmatpush.msra.mxu2 %v3695_v12  ;;  %1242 = vmatpush.msra.mxu3 %v3656_v24  ;;  %v85_v12 = vld [vmem:[#allocation5 + $0x150] sm:$0xff] }
  0x89   :  { %1114 = vmatpush.msra.mxu0 %v3684_v53  ;;  %1167 = vmatpush.msra.mxu1 %v1166_v7  ;;  %v1403_v14 = vand.u32 4294901760, %v1402_v17 }
  0x8a   :  { %1216 = vmatpush.msra.mxu2 %v3710_v45  ;;  %1244 = vmatpush.msra.mxu3 %v3672_v19 }
  0x8b   :  { %1265 = vmatpush.msrb.mxu0 %v1134_v33  ;;  %1173 = vmatpush.msra.mxu1 %v1172_v9  ;;  %v1396_v33 = vsub.f32 %v3763_v16, %v1395_v40 }
  0x8c   :  { %1337 = vmatpush.msrb.mxu2 %v3680_v36  ;;  %1246 = vmatpush.msra.mxu3 %v3684_v53 }
  0x8d   :  { %1269 = vmatpush.msrb.mxu0 %v1140_v57  ;;  %1179 = vmatpush.msra.mxu1 %v1178_v54  ;;  %v1391_v57 = vand.u32 4294901760, %v1390_v27  ;;  %v1397_v43 = vand.u32 4294901760, %v1396_v33  ;;  %v110_v54 = vld [vmem:[#allocation5 + $0x218] sm:$0xff] }
  0x8e   :  { %1339 = vmatpush.msrb.mxu2 %v3697_v22  ;;  %1374 = vmatpush.msrb.mxu3 %v1373_v55 }
  0x8f   :  { %1273 = vmatpush.msrb.mxu0 %v1146_v2  ;;  %1308 = vmatpush.msrb.mxu1 %v3600_v52  ;;  %v1413_v52 = vand.u32 4294901760, %v3804_v41  ;;  %v1408_v2 = vsub.f32 %v3790_v23, %v1407_v30 }
  0x90   :  { %1341 = vmatpush.msrb.mxu2 %v3712_v47  ;;  %1380 = vmatpush.msrb.mxu3 %v1379_v56 }
  0x91   :  { %1277 = vmatpush.msrb.mxu0 %v1152_v21  ;;  %1310 = vmatpush.msrb.mxu1 %v3609_v0  ;;  %v1414_v0 = vsub.f32 %v3804_v41, %v1413_v52  ;;  %v109_v21 = vld [vmem:[#allocation5 + $0x210] sm:$0xff] }
  0x92   :  { %1343 = vmatpush.msrb.mxu2 %v3724_v62  ;;  %1386 = vmatpush.msrb.mxu3 %v1385_v6 }
  0x93   :  { %1281 = vmatpush.msrb.mxu0 %v1158_v63  ;;  %1312 = vmatpush.msrb.mxu1 %v3621_v13  ;;  %v1409_v13 = vand.u32 4294901760, %v1408_v2 }
  0x94   :  { %1345 = vmatpush.msrb.mxu2 %v3738_v51  ;;  %1392 = vmatpush.msrb.mxu3 %v1391_v57 }
  0x95   :  { %1285 = vmatpush.msrb.mxu0 %v1164_v8  ;;  %1314 = vmatpush.msrb.mxu1 %v3632_v38  ;;  %v1415_v38 = vand.u32 4294901760, %v1414_v0 }
  0x96   :  { %1347 = vmatpush.msrb.mxu2 %v3750_v59  ;;  %1398 = vmatpush.msrb.mxu3 %v1397_v43  ;;  %v86_v43 = vld [vmem:[#allocation5 + $0x158] sm:$0xff] }
  0x97   :  { %1289 = vmatpush.msrb.mxu0 %v1170_v20  ;;  %1316 = vmatpush.msrb.mxu1 %v3642_v44  ;;  %v133_v44 = vld [vmem:[#allocation5 + $0x2d0] sm:$0xff] }
  0x98   :  { %1349 = vmatpush.msrb.mxu2 %v3766_v25  ;;  %1404 = vmatpush.msrb.mxu3 %v1403_v14 }
  0x99   :  { %1219 = vmatmul.f32.vlgmr.msra.gmra.mxu2 %v3284_v46  ;;  %1293 = vmatpush.msrb.mxu0 %v1176_v10  ;;  %v61_v10 = vld [vmem:[#allocation5 + $0x90] sm:$0xff] }
  0x9a   :  { %1318 = vmatpush.msrb.mxu1 %v3656_v24  ;;  %1351 = vmatpush.msrb.mxu2 %v3784_v48  ;;  %v3852_v24 = vand.u32 4294901760, %v133_v44  ;;  %v3924_v7 = vand.u32 4294901760, %v61_v10 }
  0x9b   :  { %1410 = vmatpush.msrb.mxu3 %v1409_v13  ;;  %1120 = vmatmul.f32.vlgmr.msra.gmra.mxu0 %v3329_v18 }
  0x9c   :  { %1250 = vmatmul.f32.vlgmr.msra.gmra.mxu3 %v3303_v15  ;;  %1432 = vmatpush.msra.mxu0 %v3705_v35  ;;  %v3866_v28 = vsub.f32 %v133_v44, %v3852_v24  ;;  %v73_v35 = vld [vmem:[#allocation5 + $0xf0] sm:$0xff]  ;;  %v3947_v31 = vsub.f32 %v61_v10, %v3924_v7 }
  0x9d   :  { %1502 = vmatpush.msra.mxu2 %v1371_v3  ;;  %1320 = vmatpush.msrb.mxu1 %v3672_v19  ;;  %v3861_v19 = vand.u32 4294901760, %v121_v4  ;;  %v3908_v3 = vand.u32 4294901760, %v73_v35 }
  0x9e   :  { %1416 = vmatpush.msrb.mxu3 %v1415_v38  ;;  %1181 = vmatmul.f32.vlgmr.msra.gmra.mxu1 %v3266_v37 }
  0x9f   :  { %1435 = vmatpush.msra.mxu0 %v3722_v29  ;;  %1506 = vmatpush.msra.mxu2 %v1377_v34  ;;  %v3879_v63 = vsub.f32 %v121_v4, %v3861_v19  ;;  %v3930_v39 = vsub.f32 %v73_v35, %v3908_v3  ;;  %v74_v4 = vld [vmem:[#allocation5 + $0xf8] sm:$0xff]  ;;  %v3990_v35 = vand.u32 4294901760, %v86_v43 }
  0xa0   :  { %1545 = vmatpush.msra.mxu3 %v3680_v36  ;;  %1322 = vmatpush.msrb.mxu1 %v3684_v53  ;;  %v3873_v53 = vand.u32 4294901760, %v109_v21 }
  0xa1   :  { %1438 = vmatpush.msra.mxu0 %v3736_v58  ;;  %1510 = vmatpush.msra.mxu2 %v1383_v61  ;;  %v1614_v20 = vand.u32 4294901760, %v3879_v63  ;;  %v134_v58 = vld [vmem:[#allocation5 + $0x2d8] sm:$0xff]  ;;  %v1638_v27 = vand.u32 4294901760, %v3930_v39 }
  0xa2   :  { %1469 = vmatpush.msra.mxu1 %v3680_v36  ;;  %1547 = vmatpush.msra.mxu3 %v3697_v22  ;;  %v97_v36 = vld [vmem:[#allocation5 + $0x1b0] sm:$0xff]  ;;  %v3892_v45 = vsub.f32 %v109_v21, %v3873_v53  ;;  %v3932_v61 = vand.u32 4294901760, %v134_v58 }
  0xa3   :  { %1441 = vmatpush.msra.mxu0 %v3748_v42  ;;  %1514 = vmatpush.msra.mxu2 %v1389_v50  ;;  %v3884_v8 = vand.u32 4294901760, %v97_v36  ;;  %v49_v42 = vld [vmem:[#allocation5 + $0x30] sm:$0xff]  ;;  %v1615_v1 = vsub.f32 %v3879_v63, %v1614_v20  ;;  %v1639_v38 = vsub.f32 %v3930_v39, %v1638_v27 }
  0xa4   :  { %1471 = vmatpush.msra.mxu1 %v3697_v22  ;;  %1549 = vmatpush.msra.mxu3 %v3712_v47  ;;  %v1608_v22 = vand.u32 4294901760, %v3866_v28  ;;  %v1620_v26 = vand.u32 4294901760, %v3892_v45  ;;  %v3936_v9 = vand.u32 4294901760, %v49_v42 }
  0xa5   :  { %1295 = vmatmul.f32.vlgmr.msrb.gmra.mxu0 %v3266_v37  ;;  %1518 = vmatpush.msra.mxu2 %v1395_v40 }
  0xa6   :  { %1473 = vmatpush.msra.mxu1 %v3712_v47  ;;  %1444 = vmatpush.msra.mxu0 %v3763_v16  ;;  %v3894_v47 = vand.u32 4294901760, %v85_v12  ;;  %v1609_v29 = vsub.f32 %v3866_v28, %v1608_v22  ;;  %v122_v16 = vld [vmem:[#allocation5 + $0x278] sm:$0xff]  ;;  %v3962_v33 = vsub.f32 %v49_v42, %v3936_v9 }
  0xa7   :  { %1551 = vmatpush.msra.mxu3 %v3724_v62  ;;  %1324 = vmatmul.f32.vlgmr.msrb.gmra.mxu1 %v3266_v37  ;;  %v3949_v40 = vand.u32 4294901760, %v122_v16 }
  0xa8   :  { %1447 = vmatpush.msra.mxu0 %v3775_v60  ;;  %1475 = vmatpush.msra.mxu1 %v3724_v62  ;;  %v3906_v62 = vsub.f32 %v97_v36, %v3884_v8  ;;  %v3917_v34 = vsub.f32 %v85_v12, %v3894_v47  ;;  %v1621_v60 = vsub.f32 %v3892_v45, %v1620_v26  ;;  %v1650_v36 = vand.u32 4294901760, %v3962_v33 }
  0xa9   :  { %1522 = vmatpush.msra.mxu2 %v1401_v49  ;;  %1553 = vmatpush.msra.mxu3 %v3738_v51  ;;  %v3957_v49 = vsub.f32 %v134_v58, %v3932_v61  ;;  %v3974_v2 = vsub.f32 %v122_v16, %v3949_v40  ;;  %v62_v16 = vld [vmem:[#allocation5 + $0x98] sm:$0xff] }
  0xaa   :  { %1450 = vmatpush.msra.mxu0 %v3790_v23  ;;  %1477 = vmatpush.msra.mxu1 %v3738_v51  ;;  %v1626_v32 = vand.u32 4294901760, %v3906_v62  ;;  %v1632_v55 = vand.u32 4294901760, %v3917_v34  ;;  %v1622_v57 = vand.u32 4294901760, %v1621_v60 }
  0xab   :  { %1526 = vmatpush.msra.mxu2 %v1407_v30  ;;  %1555 = vmatpush.msra.mxu3 %v3750_v59  ;;  %v1845_v44 = vand.u32 4294901760, %v3957_v49  ;;  %v1851_v42 = vand.u32 4294901760, %v3974_v2 }
  0xac   :  { %1357 = vmatmul.f32.vlgmr.msrb.gmra.mxu2 %v3329_v18  ;;  %1453 = vmatpush.msra.mxu0 %v3804_v41  ;;  %v173_v51 = vpop.f32.mrf.mxu0  ;;  %v1627_v56 = vsub.f32 %v3906_v62, %v1626_v32  ;;  %v3964_v41 = vand.u32 4294901760, %v110_v54  ;;  %v1633_v17 = vsub.f32 %v3917_v34, %v1632_v55 }
  0xad   :  { %1479 = vmatpush.msra.mxu1 %v3750_v59  ;;  %1530 = vmatpush.msra.mxu2 %v1413_v52  ;;  %v1610_v59 = vand.u32 4294901760, %v1609_v29  ;;  %v1644_v52 = vand.u32 4294901760, %v3947_v31 }
  0xae   :  { %1557 = vmatpush.msra.mxu3 %v3766_v25  ;;  %1574 = vmatpush.msrb.mxu0 %v3852_v24  ;;  %v1628_v13 = vand.u32 4294901760, %v1627_v56  ;;  %v3988_v12 = vsub.f32 %v110_v54, %v3964_v41  ;;  %v1634_v10 = vand.u32 4294901760, %v1633_v17  ;;  %v4015_v54 = vsub.f32 %v86_v43, %v3990_v35 }
  0xaf   :  { %1418 = vmatmul.f32.vlgmr.msrb.gmra.mxu3 %v3266_v37  ;;  %1669 = vmatpush.msrb.mxu2 %v3866_v28 }
  0xb0   :  { %v234_v5 = vpop.f32.mrf.mxu1  ;;  %1481 = vmatpush.msra.mxu1 %v3766_v25  ;;  %1559 = vmatpush.msra.mxu3 %v3784_v48  ;;  %v272_v50 = vpop.f32.mrf.mxu2  ;;  %v1616_v25 = vand.u32 4294901760, %v1615_v1  ;;  %v1857_v60 = vand.u32 4294901760, %v3988_v12 }
  0xb1   :  { %v235_v11 = vadd.f32 %v234_v5, %v173_v51  ;;  %1576 = vmatpush.msrb.mxu0 %v3861_v19  ;;  %1672 = vmatpush.msrb.mxu2 %v3879_v63  ;;  %v1645_v51 = vsub.f32 %v3947_v31, %v1644_v52  ;;  %v1640_v5 = vand.u32 4294901760, %v1639_v38 }
  0xb2   :  { %1706 = vmatpush.msrb.mxu3 %v3852_v24  ;;  %1483 = vmatpush.msra.mxu1 %v3784_v48  ;;  %v98_v48 = vld [vmem:[#allocation5 + $0x1b8] sm:$0xff]  ;;  %v303_v6 = vpop.f32.mrf.mxu3  ;;  %v1858_v43 = vsub.f32 %v3988_v12, %v1857_v60 }
  0xb3   :  { %v273_v23 = vadd.f32 %v272_v50, %v235_v11  ;;  %1578 = vmatpush.msrb.mxu0 %v3873_v53  ;;  %1675 = vmatpush.msrb.mxu2 %v3892_v45  ;;  %v3976_v14 = vand.u32 4294901760, %v98_v48  ;;  %v1846_v11 = vsub.f32 %v3957_v49, %v1845_v44  ;;  %v1651_v50 = vsub.f32 %v3962_v33, %v1650_v36 }
  0xb4   :  { %1611 = vmatpush.msrb.mxu1 %v1610_v59  ;;  %1708 = vmatpush.msrb.mxu3 %v3861_v19  ;;  %v4002_v59 = vand.u32 4294901760, %v74_v4  ;;  %v1646_v56 = vand.u32 4294901760, %v1645_v51 }
  0xb5   :  { %v304_v30 = vadd.f32 %v303_v6, %v273_v23  ;;  %1532 = vmatmul.f32.vlgmr.msra.gmra.mxu2 %v3266_v37  ;;  %1580 = vmatpush.msrb.mxu0 %v3884_v8  ;;  %v4000_v1 = vsub.f32 %v98_v48, %v3976_v14  ;;  %v50_v23 = vld [vmem:[#allocation5 + $0x38] sm:$0xff]  ;;  %v1852_v48 = vsub.f32 %v3974_v2, %v1851_v42  ;;  %v1652_v17 = vand.u32 4294901760, %v1651_v50 }
  0xb6   :  { %1617 = vmatpush.msrb.mxu1 %v1616_v25  ;;  %1678 = vmatpush.msrb.mxu2 %v3906_v62  ;;  %v348_v0 = vpop.f32.mrf.mxu0  ;;  %v4018_v25 = vand.u32 4294901760, %v62_v16 }
  0xb7   :  { %1710 = vmatpush.msrb.mxu3 %v3873_v53  ;;  %1456 = vmatmul.f32.vlgmr.msra.gmra.mxu0 %v3284_v46  ;;  %v349_v21 = vadd.f32 %v348_v0, %v304_v30  ;;  %v1863_v6 = vand.u32 4294901760, %v4000_v1  ;;  %v4027_v30 = vsub.f32 %v74_v4, %v4002_v59  ;;  %v1869_v0 = vand.u32 4294901760, %v4015_v54 }
  0xb8   :  { %1561 = vmatmul.f32.vlgmr.msra.gmra.mxu3 %v3266_v37  ;;  %1582 = vmatpush.msrb.mxu0 %v3894_v47  ;;  %v377_v29 = vpop.f32.mrf.mxu1  ;;  %v4042_v38 = vsub.f32 %v62_v16, %v4018_v25  ;;  %v1853_v4 = vand.u32 4294901760, %v1852_v48 }
  0xb9   :  { %1623 = vmatpush.msrb.mxu1 %v1622_v57  ;;  %1681 = vmatpush.msrb.mxu2 %v3917_v34  ;;  %v378_v58 = vadd.f32 %v377_v29, %v349_v21  ;;  %v1847_v57 = vand.u32 4294901760, %v1846_v11  ;;  %v1864_v21 = vsub.f32 %v4000_v1, %v1863_v6  ;;  %v1875_v29 = vand.u32 4294901760, %v4027_v30 }
  0xba   :  { %1712 = vmatpush.msrb.mxu3 %v3884_v8  ;;  %1487 = vmatmul.f32.vlgmr.msra.gmra.mxu1 %v3303_v15  ;;  %v1881_v63 = vand.u32 4294901760, %v4042_v38 }
  0xbb   :  { %1584 = vmatpush.msrb.mxu0 %v3908_v3  ;;  %1629 = vmatpush.msrb.mxu1 %v1628_v13  ;;  %2987 = vst [vmem:[#allocation7] sm:$0xff] %v378_v58  ;;  %v4036_v13 = vand.u32 4294901760, %v50_v23  ;;  %v1876_v51 = vsub.f32 %v4027_v30, %v1875_v29 }
  0xbc   :  { %1684 = vmatpush.msrb.mxu2 %v3930_v39  ;;  %1714 = vmatpush.msrb.mxu3 %v3894_v47  ;;  %v1882_v62 = vsub.f32 %v4042_v38, %v1881_v63 }
  0xbd   :  { %1586 = vmatpush.msrb.mxu0 %v3924_v7  ;;  %1635 = vmatpush.msrb.mxu1 %v1634_v10  ;;  %v1870_v10 = vsub.f32 %v4015_v54, %v1869_v0  ;;  %v4056_v58 = vsub.f32 %v50_v23, %v4036_v13  ;;  %v63_v23 = vld [vmem:[#allocation5 + $0xa0] sm:$0xff] }
  0xbe   :  { %1687 = vmatpush.msrb.mxu2 %v3947_v31  ;;  %1716 = vmatpush.msrb.mxu3 %v3908_v3  ;;  %v1883_v50 = vand.u32 4294901760, %v1882_v62 }
  0xbf   :  { %1588 = vmatpush.msrb.mxu0 %v3936_v9  ;;  %1641 = vmatpush.msrb.mxu1 %v1640_v5 }
  0xc0   :  { %1690 = vmatpush.msrb.mxu2 %v3962_v33  ;;  %1718 = vmatpush.msrb.mxu3 %v3924_v7  ;;  %v123_v33 = vld [vmem:[#allocation5 + $0x280] sm:$0xff] }
  0xc1   :  { %1739 = vmatpush.msra.mxu0 %v1608_v22  ;;  %1647 = vmatpush.msrb.mxu1 %v1646_v56  ;;  %v1859_v22 = vand.u32 4294901760, %v1858_v43 }
  0xc2   :  { %1811 = vmatpush.msra.mxu2 %v3932_v61  ;;  %1720 = vmatpush.msrb.mxu3 %v3936_v9 }
  0xc3   :  { %1743 = vmatpush.msra.mxu0 %v1614_v20  ;;  %v410_v28 = vpop.f32.mrf.mxu2  ;;  %1653 = vmatpush.msrb.mxu1 %v1652_v17  ;;  %v1865_v20 = vand.u32 4294901760, %v1864_v21  ;;  %v4176_v17 = vand.u32 4294901760, %v63_v23 }
  0xc4   :  { %1813 = vmatpush.msra.mxu2 %v3949_v40  ;;  %1848 = vmatpush.msra.mxu3 %v1847_v57 }
  0xc5   :  { %1747 = vmatpush.msra.mxu0 %v1620_v26  ;;  %1782 = vmatpush.msra.mxu1 %v3852_v24  ;;  %v1871_v24 = vand.u32 4294901760, %v1870_v10  ;;  %v1887_v26 = vand.u32 4294901760, %v4056_v58 }
  0xc6   :  { %1815 = vmatpush.msra.mxu2 %v3964_v41  ;;  %1854 = vmatpush.msra.mxu3 %v1853_v4  ;;  %v471_v16 = vpop.f32.mrf.mxu3  ;;  %v124_v4 = vld [vmem:[#allocation5 + $0x288] sm:$0xff] }
  0xc7   :  { %1751 = vmatpush.msra.mxu0 %v1626_v32  ;;  %1784 = vmatpush.msra.mxu1 %v3861_v19  ;;  %v472_v45 = vadd.f32 %v471_v16, %v410_v28  ;;  %v1877_v19 = vand.u32 4294901760, %v1876_v51  ;;  %v4201_v51 = vand.u32 4294901760, %v124_v4 }
  0xc8   :  { %1817 = vmatpush.msra.mxu2 %v3976_v14  ;;  %1860 = vmatpush.msra.mxu3 %v1859_v22  ;;  %v509_v5 = vpop.f32.mrf.mxu0 }
  0xc9   :  { %1755 = vmatpush.msra.mxu0 %v1632_v55  ;;  %1786 = vmatpush.msra.mxu1 %v3873_v53  ;;  %v510_v32 = vadd.f32 %v509_v5, %v472_v45  ;;  %v1888_v53 = vsub.f32 %v4056_v58, %v1887_v26 }
  0xca   :  { %1819 = vmatpush.msra.mxu2 %v3990_v35  ;;  %1866 = vmatpush.msra.mxu3 %v1865_v20  ;;  %v4199_v20 = vsub.f32 %v63_v23, %v4176_v17 }
  0xcb   :  { %1759 = vmatpush.msra.mxu0 %v1638_v27  ;;  %1788 = vmatpush.msra.mxu1 %v3884_v8  ;;  %v540_v11 = vpop.f32.mrf.mxu1  ;;  %v1889_v27 = vand.u32 4294901760, %v1888_v53 }
  0xcc   :  { %1821 = vmatpush.msra.mxu2 %v4002_v59  ;;  %1872 = vmatpush.msra.mxu3 %v1871_v24  ;;  %v541_v34 = vadd.f32 %v540_v11, %v510_v32  ;;  %v585_v55 = vpop.f32.mrf.mxu2 }
  0xcd   :  { %1763 = vmatpush.msra.mxu0 %v1644_v52  ;;  %1790 = vmatpush.msra.mxu1 %v3894_v47  ;;  %v135_v47 = vld [vmem:[#allocation5 + $0x2e0] sm:$0xff] }
  0xce   :  { %1823 = vmatpush.msra.mxu2 %v4018_v25  ;;  %1878 = vmatpush.msra.mxu3 %v1877_v19  ;;  %v586_v8 = vadd.f32 %v585_v55, %v541_v34  ;;  %v88_v34 = vld [vmem:[#allocation5 + $0x168] sm:$0xff]  ;;  %v2118_v55 = vand.u32 4294901760, %v4199_v20 }
  0xcf   :  { %1693 = vmatmul.f32.vlgmr.msrb.gmra.mxu2 %v3284_v46  ;;  %1767 = vmatpush.msra.mxu0 %v1650_v36  ;;  %v614_v39 = vpop.f32.mrf.mxu3 }
  0xd0   :  { %1792 = vmatpush.msra.mxu1 %v3908_v3  ;;  %1825 = vmatpush.msra.mxu2 %v4036_v13  ;;  %v615_v31 = vadd.f32 %v614_v39, %v586_v8  ;;  %v4104_v3 = vand.u32 4294901760, %v135_v47 }
  0xd1   :  { %1884 = vmatpush.msra.mxu3 %v1883_v50  ;;  %1594 = vmatmul.f32.vlgmr.msrb.gmra.mxu0 %v3329_v18  ;;  %v4226_v50 = vsub.f32 %v124_v4, %v4201_v51  ;;  %v64_v4 = vld [vmem:[#allocation5 + $0xa8] sm:$0xff] }
  0xd2   :  { %1724 = vmatmul.f32.vlgmr.msrb.gmra.mxu3 %v3303_v15  ;;  %1906 = vmatpush.msrb.mxu0 %v3957_v49  ;;  %2988 = vst [vmem:[#allocation7 + $0x8] sm:$0xff] %v615_v31  ;;  %v111_v49 = vld [vmem:[#allocation5 + $0x220] sm:$0xff]  ;;  %v4118_v52 = vsub.f32 %v135_v47, %v4104_v3 }
  0xd3   :  { %1976 = vmatpush.msrb.mxu2 %v1845_v44  ;;  %1794 = vmatpush.msra.mxu1 %v3924_v7  ;;  %v4113_v7 = vand.u32 4294901760, %v123_v33 }
  0xd4   :  { %1890 = vmatpush.msra.mxu3 %v1889_v27  ;;  %1655 = vmatmul.f32.vlgmr.msrb.gmra.mxu1 %v3266_v37  ;;  %v2082_v44 = vand.u32 4294901760, %v4118_v52 }
  0xd5   :  { %1909 = vmatpush.msrb.mxu0 %v3974_v2  ;;  %1980 = vmatpush.msrb.mxu2 %v1851_v42  ;;  %v87_v2 = vld [vmem:[#allocation5 + $0x160] sm:$0xff] }
  0xd6   :  { %2019 = vmatpush.msrb.mxu3 %v3932_v61  ;;  %1796 = vmatpush.msra.mxu1 %v3936_v9  ;;  %v4125_v9 = vand.u32 4294901760, %v111_v49  ;;  %v4146_v42 = vand.u32 4294901760, %v87_v2 }
  0xd7   :  { %1912 = vmatpush.msrb.mxu0 %v3988_v12  ;;  %1984 = vmatpush.msrb.mxu2 %v1857_v60 }
  0xd8   :  { %1943 = vmatpush.msrb.mxu1 %v3932_v61  ;;  %2021 = vmatpush.msrb.mxu3 %v3949_v40  ;;  %v99_v61 = vld [vmem:[#allocation5 + $0x1c0] sm:$0xff]  ;;  %v4144_v12 = vsub.f32 %v111_v49, %v4125_v9 }
  0xd9   :  { %1915 = vmatpush.msrb.mxu0 %v4000_v1  ;;  %1988 = vmatpush.msrb.mxu2 %v1863_v6  ;;  %v4136_v36 = vand.u32 4294901760, %v99_v61  ;;  %v4169_v6 = vsub.f32 %v87_v2, %v4146_v42 }
  0xda   :  { %1945 = vmatpush.msrb.mxu1 %v3949_v40  ;;  %2023 = vmatpush.msrb.mxu3 %v3964_v41  ;;  %v4131_v40 = vsub.f32 %v123_v33, %v4113_v7  ;;  %v2094_v48 = vand.u32 4294901760, %v4144_v12  ;;  %v76_v33 = vld [vmem:[#allocation5 + $0x108] sm:$0xff] }
  0xdb   :  { %1769 = vmatmul.f32.vlgmr.msra.gmra.mxu0 %v3266_v37  ;;  %1992 = vmatpush.msrb.mxu2 %v1869_v0  ;;  %v4158_v60 = vsub.f32 %v99_v61, %v4136_v36 }
  0xdc   :  { %1947 = vmatpush.msrb.mxu1 %v3964_v41  ;;  %1918 = vmatpush.msrb.mxu0 %v4015_v54  ;;  %v75_v41 = vld [vmem:[#allocation5 + $0x100] sm:$0xff]  ;;  %v2088_v1 = vand.u32 4294901760, %v4131_v40  ;;  %v2095_v10 = vsub.f32 %v4144_v12, %v2094_v48 }
  0xdd   :  { %2025 = vmatpush.msrb.mxu3 %v3976_v14  ;;  %1798 = vmatmul.f32.vlgmr.msra.gmra.mxu1 %v3266_v37  ;;  %v4160_v54 = vand.u32 4294901760, %v75_v41  ;;  %v2100_v43 = vand.u32 4294901760, %v4158_v60 }
  0xde   :  { %1921 = vmatpush.msrb.mxu0 %v4027_v30  ;;  %1949 = vmatpush.msrb.mxu1 %v3976_v14  ;;  %v2083_v14 = vsub.f32 %v4118_v52, %v2082_v44  ;;  %v51_v30 = vld [vmem:[#allocation5 + $0x40] sm:$0xff]  ;;  %v2089_v57 = vsub.f32 %v4131_v40, %v2088_v1  ;;  %v2096_v11 = vand.u32 4294901760, %v2095_v10 }
  0xdf   :  { %1996 = vmatpush.msrb.mxu2 %v1875_v29  ;;  %2027 = vmatpush.msrb.mxu3 %v3990_v35  ;;  %v4182_v0 = vsub.f32 %v75_v41, %v4160_v54  ;;  %v4188_v29 = vand.u32 4294901760, %v51_v30  ;;  %v2101_v45 = vsub.f32 %v4158_v60, %v2100_v43  ;;  %v4242_v41 = vand.u32 4294901760, %v88_v34 }
  0xe0   :  { %1924 = vmatpush.msrb.mxu0 %v4042_v38  ;;  %1951 = vmatpush.msrb.mxu1 %v3990_v35  ;;  %v136_v35 = vld [vmem:[#allocation5 + $0x2e8] sm:$0xff] }
  0xe1   :  { %2000 = vmatpush.msrb.mxu2 %v1881_v63  ;;  %2029 = vmatpush.msrb.mxu3 %v4002_v59  ;;  %v4184_v38 = vand.u32 4294901760, %v136_v35  ;;  %v112_v63 = vld [vmem:[#allocation5 + $0x228] sm:$0xff]  ;;  %v2112_v24 = vand.u32 4294901760, %v4182_v0  ;;  %v4214_v62 = vsub.f32 %v51_v30, %v4188_v29  ;;  %v2102_v27 = vand.u32 4294901760, %v2101_v45 }
  0xe2   :  { %1831 = vmatmul.f32.vlgmr.msra.gmra.mxu2 %v3329_v18  ;;  %1927 = vmatpush.msrb.mxu0 %v4056_v58  ;;  %v647_v56 = vpop.f32.mrf.mxu0  ;;  %v2106_v58 = vand.u32 4294901760, %v4169_v6  ;;  %v4216_v32 = vand.u32 4294901760, %v112_v63  ;;  %v2325_v30 = vand.u32 4294901760, %v4226_v50 }
  0xe3   :  { %1953 = vmatpush.msrb.mxu1 %v4002_v59  ;;  %2004 = vmatpush.msrb.mxu2 %v1887_v26  ;;  %v2084_v59 = vand.u32 4294901760, %v2083_v14  ;;  %v4209_v26 = vsub.f32 %v136_v35, %v4184_v38  ;;  %v2113_v31 = vsub.f32 %v4182_v0, %v2112_v24  ;;  %v2124_v61 = vand.u32 4294901760, %v4214_v62 }
  0xe4   :  { %2031 = vmatpush.msrb.mxu3 %v4018_v25  ;;  %2048 = vmatpush.msra.mxu0 %v4104_v3  ;;  %v2107_v53 = vsub.f32 %v4169_v6, %v2106_v58  ;;  %v4240_v2 = vsub.f32 %v112_v63, %v4216_v32  ;;  %v4267_v63 = vsub.f32 %v88_v34, %v4242_v41 }
  0xe5   :  { %1892 = vmatmul.f32.vlgmr.msra.gmra.mxu3 %v3266_v37  ;;  %2143 = vmatpush.msra.mxu2 %v4118_v52  ;;  %v708_v21 = vpop.f32.mrf.mxu1  ;;  %v2319_v47 = vand.u32 4294901760, %v4209_v26 }
  0xe6   :  { %1955 = vmatpush.msrb.mxu1 %v4018_v25  ;;  %2033 = vmatpush.msrb.mxu3 %v4036_v13  ;;  %v709_v28 = vadd.f32 %v708_v21, %v647_v56  ;;  %v746_v22 = vpop.f32.mrf.mxu2  ;;  %v2090_v25 = vand.u32 4294901760, %v2089_v57  ;;  %v2108_v23 = vand.u32 4294901760, %v2107_v53  ;;  %v2119_v56 = vsub.f32 %v4199_v20, %v2118_v55 }
  0xe7   :  { %2050 = vmatpush.msra.mxu0 %v4113_v7  ;;  %2146 = vmatpush.msra.mxu2 %v4131_v40  ;;  %v2114_v21 = vand.u32 4294901760, %v2113_v31  ;;  %v2331_v10 = vand.u32 4294901760, %v4240_v2 }
  0xe8   :  { %2180 = vmatpush.msra.mxu3 %v4104_v3  ;;  %1957 = vmatpush.msrb.mxu1 %v4036_v13  ;;  %v747_v16 = vadd.f32 %v746_v22, %v709_v28  ;;  %v100_v13 = vld [vmem:[#allocation5 + $0x1c8] sm:$0xff]  ;;  %v2320_v28 = vsub.f32 %v4209_v26, %v2319_v47  ;;  %v2125_v22 = vsub.f32 %v4214_v62, %v2124_v61  ;;  %v2120_v45 = vand.u32 4294901760, %v2119_v56 }
  0xe9   :  { %2052 = vmatpush.msra.mxu0 %v4125_v9  ;;  %v777_v5 = vpop.f32.mrf.mxu3  ;;  %2149 = vmatpush.msra.mxu2 %v4144_v12  ;;  %v4228_v8 = vand.u32 4294901760, %v100_v13  ;;  %v2332_v34 = vsub.f32 %v4240_v2, %v2331_v10 }
  0xea   :  { %2085 = vmatpush.msra.mxu1 %v2084_v59  ;;  %2182 = vmatpush.msra.mxu3 %v4113_v7  ;;  %v778_v19 = vadd.f32 %v777_v5, %v747_v16  ;;  %v4254_v59 = vand.u32 4294901760, %v76_v33  ;;  %v52_v16 = vld [vmem:[#allocation5 + $0x48] sm:$0xff]  ;;  %v2126_v53 = vand.u32 4294901760, %v2125_v22 }
  0xeb   :  { %2006 = vmatmul.f32.vlgmr.msrb.gmra.mxu2 %v3266_v37  ;;  %2054 = vmatpush.msra.mxu0 %v4136_v36  ;;  %v4252_v57 = vsub.f32 %v100_v13, %v4228_v8  ;;  %v2326_v13 = vsub.f32 %v4226_v50, %v2325_v30 }
  0xec   :  { %2091 = vmatpush.msra.mxu1 %v2090_v25  ;;  %2152 = vmatpush.msra.mxu2 %v4158_v60  ;;  %v822_v39 = vpop.f32.mrf.mxu0  ;;  %v4270_v25 = vand.u32 4294901760, %v64_v4 }
  0xed   :  { %2184 = vmatpush.msra.mxu3 %v4125_v9  ;;  %1930 = vmatmul.f32.vlgmr.msrb.gmra.mxu0 %v3284_v46  ;;  %v823_v49 = vadd.f32 %v822_v39, %v778_v19  ;;  %v2337_v5 = vand.u32 4294901760, %v4252_v57  ;;  %v4279_v19 = vsub.f32 %v76_v33, %v4254_v59  ;;  %v2343_v39 = vand.u32 4294901760, %v4267_v63 }
  0xee   :  { %2035 = vmatmul.f32.vlgmr.msrb.gmra.mxu3 %v3266_v37  ;;  %2056 = vmatpush.msra.mxu0 %v4146_v42  ;;  %v851_v14 = vpop.f32.mrf.mxu1  ;;  %v4294_v31 = vsub.f32 %v64_v4, %v4270_v25  ;;  %v2327_v33 = vand.u32 4294901760, %v2326_v13 }
  0xef   :  { %2097 = vmatpush.msra.mxu1 %v2096_v11  ;;  %2155 = vmatpush.msra.mxu2 %v4169_v6  ;;  %v852_v35 = vadd.f32 %v851_v14, %v823_v49  ;;  %v2321_v11 = vand.u32 4294901760, %v2320_v28  ;;  %v2338_v49 = vsub.f32 %v4252_v57, %v2337_v5  ;;  %v2349_v14 = vand.u32 4294901760, %v4279_v19 }
  0xf0   :  { %2186 = vmatpush.msra.mxu3 %v4136_v36  ;;  %1961 = vmatmul.f32.vlgmr.msrb.gmra.mxu1 %v3303_v15  ;;  %v2355_v40 = vand.u32 4294901760, %v4294_v31 }
  0xf1   :  { %2058 = vmatpush.msra.mxu0 %v4160_v54  ;;  %2103 = vmatpush.msra.mxu1 %v2102_v27  ;;  %2989 = vst [vmem:[#allocation7 + $0x10] sm:$0xff] %v852_v35  ;;  %v4288_v27 = vand.u32 4294901760, %v52_v16  ;;  %v2350_v56 = vsub.f32 %v4279_v19, %v2349_v14 }
  0xf2   :  { %2158 = vmatpush.msra.mxu2 %v4182_v0  ;;  %2188 = vmatpush.msra.mxu3 %v4146_v42  ;;  %v2356_v60 = vsub.f32 %v4294_v31, %v2355_v40 }
  0xf3   :  { %2060 = vmatpush.msra.mxu0 %v4176_v17  ;;  %2109 = vmatpush.msra.mxu1 %v2108_v23  ;;  %v2344_v23 = vsub.f32 %v4267_v63, %v2343_v39  ;;  %v4308_v35 = vsub.f32 %v52_v16, %v4288_v27  ;;  %v65_v16 = vld [vmem:[#allocation5 + $0xb0] sm:$0xff] }
  0xf4   :  { %2161 = vmatpush.msra.mxu2 %v4199_v20  ;;  %2190 = vmatpush.msra.mxu3 %v4160_v54  ;;  %v2357_v22 = vand.u32 4294901760, %v2356_v60 }
  0xf5   :  { %2062 = vmatpush.msra.mxu0 %v4188_v29  ;;  %2115 = vmatpush.msra.mxu1 %v2114_v21 }
  0xf6   :  { %2164 = vmatpush.msra.mxu2 %v4214_v62  ;;  %2192 = vmatpush.msra.mxu3 %v4176_v17  ;;  %v125_v62 = vld [vmem:[#allocation5 + $0x290] sm:$0xff] }
  0xf7   :  { %2213 = vmatpush.msrb.mxu0 %v2082_v44  ;;  %2121 = vmatpush.msra.mxu1 %v2120_v45  ;;  %v2333_v44 = vand.u32 4294901760, %v2332_v34 }
  0xf8   :  { %2285 = vmatpush.msrb.mxu2 %v4184_v38  ;;  %2194 = vmatpush.msra.mxu3 %v4188_v29 }
  0xf9   :  { %2217 = vmatpush.msrb.mxu0 %v2088_v1  ;;  %v884_v52 = vpop.f32.mrf.mxu2  ;;  %2127 = vmatpush.msra.mxu1 %v2126_v53  ;;  %v2339_v1 = vand.u32 4294901760, %v2338_v49  ;;  %v4428_v53 = vand.u32 4294901760, %v65_v16 }
  0xfa   :  { %2287 = vmatpush.msrb.mxu2 %v4201_v51  ;;  %2322 = vmatpush.msrb.mxu3 %v2321_v11 }
  0xfb   :  { %2221 = vmatpush.msrb.mxu0 %v2094_v48  ;;  %2256 = vmatpush.msrb.mxu1 %v4104_v3  ;;  %v2345_v3 = vand.u32 4294901760, %v2344_v23  ;;  %v2361_v48 = vand.u32 4294901760, %v4308_v35 }
  0xfc   :  { %2289 = vmatpush.msrb.mxu2 %v4216_v32  ;;  %2328 = vmatpush.msrb.mxu3 %v2327_v33  ;;  %v945_v4 = vpop.f32.mrf.mxu3  ;;  %v126_v33 = vld [vmem:[#allocation5 + $0x298] sm:$0xff] }
  0xfd   :  { %2225 = vmatpush.msrb.mxu0 %v2100_v43  ;;  %2258 = vmatpush.msrb.mxu1 %v4113_v7  ;;  %v946_v12 = vadd.f32 %v945_v4, %v884_v52  ;;  %v2351_v7 = vand.u32 4294901760, %v2350_v56  ;;  %v4453_v56 = vand.u32 4294901760, %v126_v33 }
  0xfe   :  { %2291 = vmatpush.msrb.mxu2 %v4228_v8  ;;  %2334 = vmatpush.msrb.mxu3 %v2333_v44  ;;  %v983_v21 = vpop.f32.mrf.mxu0 }
  0xff   :  { %2229 = vmatpush.msrb.mxu0 %v2106_v58  ;;  %2260 = vmatpush.msrb.mxu1 %v4125_v9  ;;  %v984_v43 = vadd.f32 %v983_v21, %v946_v12  ;;  %v2362_v9 = vsub.f32 %v4308_v35, %v2361_v48 }
 0x100   :  { %2293 = vmatpush.msrb.mxu2 %v4242_v41  ;;  %2340 = vmatpush.msrb.mxu3 %v2339_v1  ;;  %v4451_v1 = vsub.f32 %v65_v16, %v4428_v53 }
 0x101   :  { %2233 = vmatpush.msrb.mxu0 %v2112_v24  ;;  %2262 = vmatpush.msrb.mxu1 %v4136_v36  ;;  %v1014_v28 = vpop.f32.mrf.mxu1  ;;  %v2363_v24 = vand.u32 4294901760, %v2362_v9 }
 0x102   :  { %2295 = vmatpush.msrb.mxu2 %v4254_v59  ;;  %2346 = vmatpush.msrb.mxu3 %v2345_v3  ;;  %v1015_v6 = vadd.f32 %v1014_v28, %v984_v43  ;;  %v1059_v58 = vpop.f32.mrf.mxu2 }
 0x103   :  { %2237 = vmatpush.msrb.mxu0 %v2118_v55  ;;  %2264 = vmatpush.msrb.mxu1 %v4146_v42  ;;  %v137_v42 = vld [vmem:[#allocation5 + $0x2f0] sm:$0xff] }
 0x104   :  { %2297 = vmatpush.msrb.mxu2 %v4270_v25  ;;  %2352 = vmatpush.msrb.mxu3 %v2351_v7  ;;  %v1060_v36 = vadd.f32 %v1059_v58, %v1015_v6  ;;  %v90_v6 = vld [vmem:[#allocation5 + $0x178] sm:$0xff]  ;;  %v2592_v58 = vand.u32 4294901760, %v4451_v1 }
 0x105   :  { %2167 = vmatmul.f32.vlgmr.msra.gmra.mxu2 %v3284_v46  ;;  %2241 = vmatpush.msrb.mxu0 %v2124_v61  ;;  %v1088_v0 = vpop.f32.mrf.mxu3 }
 0x106   :  { %2266 = vmatpush.msrb.mxu1 %v4160_v54  ;;  %2299 = vmatpush.msrb.mxu2 %v4288_v27  ;;  %v1089_v20 = vadd.f32 %v1088_v0, %v1060_v36  ;;  %v4356_v54 = vand.u32 4294901760, %v137_v42 }
 0x107   :  { %2358 = vmatpush.msrb.mxu3 %v2357_v22  ;;  %2068 = vmatmul.f32.vlgmr.msra.gmra.mxu0 %v3329_v18  ;;  %v4478_v22 = vsub.f32 %v126_v33, %v4453_v56 }
 0x108   :  { %2198 = vmatmul.f32.vlgmr.msra.gmra.mxu3 %v3303_v15  ;;  %2380 = vmatpush.msra.mxu0 %v4209_v26  ;;  %2990 = vst [vmem:[#allocation7 + $0x18] sm:$0xff] %v1089_v20  ;;  %v113_v26 = vld [vmem:[#allocation5 + $0x230] sm:$0xff]  ;;  %v4370_v55 = vsub.f32 %v137_v42, %v4356_v54 }
 0x109   :  { %2450 = vmatpush.msra.mxu2 %v2319_v47  ;;  %2268 = vmatpush.msrb.mxu1 %v4176_v17  ;;  %v4365_v17 = vand.u32 4294901760, %v125_v62 }
 0x10a   :  { %2364 = vmatpush.msrb.mxu3 %v2363_v24  ;;  %2129 = vmatmul.f32.vlgmr.msra.gmra.mxu1 %v3266_v37  ;;  %v2556_v47 = vand.u32 4294901760, %v4370_v55 }
 0x10b   :  { %2383 = vmatpush.msra.mxu0 %v4226_v50  ;;  %2454 = vmatpush.msra.mxu2 %v2325_v30  ;;  %v89_v50 = vld [vmem:[#allocation5 + $0x170] sm:$0xff] }
 0x10c   :  { %2493 = vmatpush.msra.mxu3 %v4184_v38  ;;  %2270 = vmatpush.msrb.mxu1 %v4188_v29  ;;  %v4377_v29 = vand.u32 4294901760, %v113_v26  ;;  %v4398_v30 = vand.u32 4294901760, %v89_v50 }
 0x10d   :  { %2386 = vmatpush.msra.mxu0 %v4240_v2  ;;  %2458 = vmatpush.msra.mxu2 %v2331_v10 }
 0x10e   :  { %2417 = vmatpush.msra.mxu1 %v4184_v38  ;;  %2495 = vmatpush.msra.mxu3 %v4201_v51  ;;  %v101_v38 = vld [vmem:[#allocation5 + $0x1d0] sm:$0xff]  ;;  %v4396_v2 = vsub.f32 %v113_v26, %v4377_v29 }
 0x10f   :  { %2389 = vmatpush.msra.mxu0 %v4252_v57  ;;  %2462 = vmatpush.msra.mxu2 %v2337_v5  ;;  %v4388_v61 = vand.u32 4294901760, %v101_v38  ;;  %v4421_v5 = vsub.f32 %v89_v50, %v4398_v30  ;;  %v4494_v50 = vand.u32 4294901760, %v90_v6 }
 0x110   :  { %2419 = vmatpush.msra.mxu1 %v4201_v51  ;;  %2497 = vmatpush.msra.mxu3 %v4216_v32  ;;  %v4383_v51 = vsub.f32 %v125_v62, %v4365_v17  ;;  %v2568_v13 = vand.u32 4294901760, %v4396_v2 }
 0x111   :  { %2243 = vmatmul.f32.vlgmr.msrb.gmra.mxu0 %v3266_v37  ;;  %2466 = vmatpush.msra.mxu2 %v2343_v39  ;;  %v4410_v10 = vsub.f32 %v101_v38, %v4388_v61 }
 0x112   :  { %2421 = vmatpush.msra.mxu1 %v4216_v32  ;;  %2392 = vmatpush.msra.mxu0 %v4267_v63  ;;  %v77_v32 = vld [vmem:[#allocation5 + $0x110] sm:$0xff]  ;;  %v2562_v57 = vand.u32 4294901760, %v4383_v51  ;;  %v2569_v23 = vsub.f32 %v4396_v2, %v2568_v13 }
 0x113   :  { %2499 = vmatpush.msra.mxu3 %v4228_v8  ;;  %2272 = vmatmul.f32.vlgmr.msrb.gmra.mxu1 %v3266_v37  ;;  %v4412_v63 = vand.u32 4294901760, %v77_v32  ;;  %v2574_v34 = vand.u32 4294901760, %v4410_v10 }
 0x114   :  { %2395 = vmatpush.msra.mxu0 %v4279_v19  ;;  %2423 = vmatpush.msra.mxu1 %v4228_v8  ;;  %v2557_v8 = vsub.f32 %v4370_v55, %v2556_v47  ;;  %v53_v19 = vld [vmem:[#allocation5 + $0x50] sm:$0xff]  ;;  %v2563_v11 = vsub.f32 %v4383_v51, %v2562_v57  ;;  %v2570_v28 = vand.u32 4294901760, %v2569_v23 }
 0x115   :  { %2470 = vmatpush.msra.mxu2 %v2349_v14  ;;  %2501 = vmatpush.msra.mxu3 %v4242_v41  ;;  %v4434_v39 = vsub.f32 %v77_v32, %v4412_v63  ;;  %v4440_v14 = vand.u32 4294901760, %v53_v19  ;;  %v2575_v12 = vsub.f32 %v4410_v10, %v2574_v34  ;;  %v78_v32 = vld [vmem:[#allocation5 + $0x118] sm:$0xff] }
 0x116   :  { %2398 = vmatpush.msra.mxu0 %v4294_v31  ;;  %2425 = vmatpush.msra.mxu1 %v4242_v41  ;;  %v138_v41 = vld [vmem:[#allocation5 + $0x2f8] sm:$0xff] }
 0x117   :  { %2474 = vmatpush.msra.mxu2 %v2355_v40  ;;  %2503 = vmatpush.msra.mxu3 %v4254_v59  ;;  %v4436_v31 = vand.u32 4294901760, %v138_v41  ;;  %v114_v40 = vld [vmem:[#allocation5 + $0x238] sm:$0xff]  ;;  %v2586_v3 = vand.u32 4294901760, %v4434_v39  ;;  %v4466_v60 = vsub.f32 %v53_v19, %v4440_v14  ;;  %v2576_v24 = vand.u32 4294901760, %v2575_v12 }
 0x118   :  { %2305 = vmatmul.f32.vlgmr.msrb.gmra.mxu2 %v3329_v18  ;;  %2401 = vmatpush.msra.mxu0 %v4308_v35  ;;  %v1121_v45 = vpop.f32.mrf.mxu0  ;;  %v2580_v35 = vand.u32 4294901760, %v4421_v5  ;;  %v4468_v43 = vand.u32 4294901760, %v114_v40  ;;  %v2799_v19 = vand.u32 4294901760, %v4478_v22 }
 0x119   :  { %2427 = vmatpush.msra.mxu1 %v4254_v59  ;;  %2478 = vmatpush.msra.mxu2 %v2361_v48  ;;  %v2558_v59 = vand.u32 4294901760, %v2557_v8  ;;  %v4461_v48 = vsub.f32 %v138_v41, %v4436_v31  ;;  %v2587_v20 = vsub.f32 %v4434_v39, %v2586_v3  ;;  %v2598_v26 = vand.u32 4294901760, %v4466_v60 }
 0x11a   :  { %2505 = vmatpush.msra.mxu3 %v4270_v25  ;;  %2522 = vmatpush.msrb.mxu0 %v4356_v54  ;;  %v2581_v9 = vsub.f32 %v4421_v5, %v2580_v35  ;;  %v4492_v38 = vsub.f32 %v114_v40, %v4468_v43  ;;  %v4519_v40 = vsub.f32 %v90_v6, %v4494_v50 }
 0x11b   :  { %2366 = vmatmul.f32.vlgmr.msrb.gmra.mxu3 %v3266_v37  ;;  %2617 = vmatpush.msrb.mxu2 %v4370_v55  ;;  %v1182_v49 = vpop.f32.mrf.mxu1  ;;  %v2793_v42 = vand.u32 4294901760, %v4461_v48  ;;  %v2800_v12 = vsub.f32 %v4478_v22, %v2799_v19 }
 0x11c   :  { %2429 = vmatpush.msra.mxu1 %v4270_v25  ;;  %2507 = vmatpush.msra.mxu3 %v4288_v27  ;;  %v1183_v52 = vadd.f32 %v1182_v49, %v1121_v45  ;;  %v1220_v44 = vpop.f32.mrf.mxu2  ;;  %v2564_v25 = vand.u32 4294901760, %v2563_v11  ;;  %v2582_v16 = vand.u32 4294901760, %v2581_v9  ;;  %v2593_v45 = vsub.f32 %v4451_v1, %v2592_v58 }
 0x11d   :  { %2524 = vmatpush.msrb.mxu0 %v4365_v17  ;;  %2620 = vmatpush.msrb.mxu2 %v4383_v51  ;;  %v2794_v33 = vsub.f32 %v4461_v48, %v2793_v42  ;;  %v4510_v49 = vand.u32 4294901760, %v78_v32  ;;  %v2805_v23 = vand.u32 4294901760, %v4492_v38 }
 0x11e   :  { %2654 = vmatpush.msrb.mxu3 %v4356_v54  ;;  %2431 = vmatpush.msra.mxu1 %v4288_v27  ;;  %v1221_v4 = vadd.f32 %v1220_v44, %v1183_v52  ;;  %v102_v27 = vld [vmem:[#allocation5 + $0x1d8] sm:$0xff]  ;;  %v2599_v44 = vsub.f32 %v4466_v60, %v2598_v26 }
 0x11f   :  { %2526 = vmatpush.msrb.mxu0 %v4377_v29  ;;  %v1251_v21 = vpop.f32.mrf.mxu3  ;;  %2623 = vmatpush.msrb.mxu2 %v4396_v2  ;;  %v4480_v36 = vand.u32 4294901760, %v102_v27  ;;  %v66_v52 = vld [vmem:[#allocation5 + $0xb8] sm:$0xff]  ;;  %v2806_v6 = vsub.f32 %v4492_v38, %v2805_v23 }
 0x120   :  { %2559 = vmatpush.msrb.mxu1 %v2558_v59  ;;  %2656 = vmatpush.msrb.mxu3 %v4365_v17  ;;  %v1252_v7 = vadd.f32 %v1251_v21, %v1221_v4  ;;  %v2588_v59 = vand.u32 4294901760, %v2587_v20  ;;  %v2594_v4 = vand.u32 4294901760, %v2593_v45  ;;  %v4528_v21 = vand.u32 4294901760, %v66_v52 }
 0x121   :  { %2480 = vmatmul.f32.vlgmr.msra.gmra.mxu2 %v3266_v37  ;;  %2528 = vmatpush.msrb.mxu0 %v4388_v61  ;;  %v4504_v11 = vsub.f32 %v102_v27, %v4480_v36  ;;  %v2600_v9 = vand.u32 4294901760, %v2599_v44  ;;  %v2801_v20 = vand.u32 4294901760, %v2800_v12 }
 0x122   :  { %2565 = vmatpush.msrb.mxu1 %v2564_v25  ;;  %2626 = vmatpush.msrb.mxu2 %v4410_v10  ;;  %v1296_v0 = vpop.f32.mrf.mxu0  ;;  %v54_v25 = vld [vmem:[#allocation5 + $0x58] sm:$0xff] }
 0x123   :  { %2658 = vmatpush.msrb.mxu3 %v4377_v29  ;;  %2404 = vmatmul.f32.vlgmr.msra.gmra.mxu0 %v3284_v46  ;;  %v1297_v62 = vadd.f32 %v1296_v0, %v1252_v7  ;;  %v2811_v27 = vand.u32 4294901760, %v4504_v11  ;;  %v2795_v7 = vand.u32 4294901760, %v2794_v33  ;;  %v2817_v0 = vand.u32 4294901760, %v4519_v40 }
 0x124   :  { %2509 = vmatmul.f32.vlgmr.msra.gmra.mxu3 %v3266_v37  ;;  %2530 = vmatpush.msrb.mxu0 %v4398_v30  ;;  %v1325_v8 = vpop.f32.mrf.mxu1 }
 0x125   :  { %2571 = vmatpush.msrb.mxu1 %v2570_v28  ;;  %2629 = vmatpush.msrb.mxu2 %v4421_v5  ;;  %v1326_v41 = vadd.f32 %v1325_v8, %v1297_v62  ;;  %v4532_v28 = vsub.f32 %v78_v32, %v4510_v49  ;;  %v2812_v62 = vsub.f32 %v4504_v11, %v2811_v27  ;;  %v2807_v8 = vand.u32 4294901760, %v2806_v6 }
 0x126   :  { %2660 = vmatpush.msrb.mxu3 %v4388_v61  ;;  %2435 = vmatmul.f32.vlgmr.msra.gmra.mxu1 %v3303_v15  ;;  %v4550_v32 = vsub.f32 %v66_v52, %v4528_v21 }
 0x127   :  { %2532 = vmatpush.msrb.mxu0 %v4412_v63  ;;  %2577 = vmatpush.msrb.mxu1 %v2576_v24  ;;  %2991 = vst [vmem:[#allocation7 + $0x20] sm:$0xff] %v1326_v41  ;;  %v4540_v24 = vand.u32 4294901760, %v54_v25  ;;  %v2823_v55 = vand.u32 4294901760, %v4532_v28  ;;  %v2813_v51 = vand.u32 4294901760, %v2812_v62 }
 0x128   :  { %2632 = vmatpush.msrb.mxu2 %v4434_v39  ;;  %2662 = vmatpush.msrb.mxu3 %v4398_v30 }
 0x129   :  { %2534 = vmatpush.msrb.mxu0 %v4428_v53  ;;  %2583 = vmatpush.msrb.mxu1 %v2582_v16  ;;  %v2818_v16 = vsub.f32 %v4519_v40, %v2817_v0  ;;  %v4560_v41 = vsub.f32 %v54_v25, %v4540_v24 }
 0x12a   :  { %2635 = vmatpush.msrb.mxu2 %v4451_v1  ;;  %2664 = vmatpush.msrb.mxu3 %v4412_v63 }
 0x12b   :  { %2536 = vmatpush.msrb.mxu0 %v4440_v14  ;;  %2589 = vmatpush.msrb.mxu1 %v2588_v59  ;;  %v2824_v59 = vsub.f32 %v4532_v28, %v2823_v55 }
 0x12c   :  { %2638 = vmatpush.msrb.mxu2 %v4466_v60  ;;  %2666 = vmatpush.msrb.mxu3 %v4428_v53 }
 0x12d   :  { %2687 = vmatpush.msra.mxu0 %v2556_v47  ;;  %2595 = vmatpush.msrb.mxu1 %v2594_v4 }
 0x12e   :  { %2759 = vmatpush.msra.mxu2 %v4436_v31  ;;  %2668 = vmatpush.msrb.mxu3 %v4440_v14 }
 0x12f   :  { %2691 = vmatpush.msra.mxu0 %v2562_v57  ;;  %v1358_v47 = vpop.f32.mrf.mxu2  ;;  %2601 = vmatpush.msrb.mxu1 %v2600_v9  ;;  %v2829_v57 = vand.u32 4294901760, %v4550_v32 }
 0x130   :  { %2761 = vmatpush.msra.mxu2 %v4453_v56  ;;  %2796 = vmatpush.msra.mxu3 %v2795_v7 }
 0x131   :  { %2695 = vmatpush.msra.mxu0 %v2568_v13  ;;  %2730 = vmatpush.msra.mxu1 %v4356_v54  ;;  %v2819_v54 = vand.u32 4294901760, %v2818_v16  ;;  %v2835_v13 = vand.u32 4294901760, %v4560_v41 }
 0x132   :  { %2763 = vmatpush.msra.mxu2 %v4468_v43  ;;  %2802 = vmatpush.msra.mxu3 %v2801_v20  ;;  %v1419_v45 = vpop.f32.mrf.mxu3 }
 0x133   :  { %2699 = vmatpush.msra.mxu0 %v2574_v34  ;;  %2732 = vmatpush.msra.mxu1 %v4365_v17  ;;  %v1420_v2 = vadd.f32 %v1419_v45, %v1358_v47  ;;  %v2830_v17 = vsub.f32 %v4550_v32, %v2829_v57  ;;  %v2825_v34 = vand.u32 4294901760, %v2824_v59 }
 0x134   :  { %2765 = vmatpush.msra.mxu2 %v4480_v36  ;;  %2808 = vmatpush.msra.mxu3 %v2807_v8  ;;  %v1457_v33 = vpop.f32.mrf.mxu0 }
 0x135   :  { %2703 = vmatpush.msra.mxu0 %v2580_v35  ;;  %2734 = vmatpush.msra.mxu1 %v4377_v29  ;;  %v1458_v10 = vadd.f32 %v1457_v33, %v1420_v2  ;;  %v2836_v29 = vsub.f32 %v4560_v41, %v2835_v13 }
 0x136   :  { %2767 = vmatpush.msra.mxu2 %v4494_v50  ;;  %2814 = vmatpush.msra.mxu3 %v2813_v51 }
 0x137   :  { %2707 = vmatpush.msra.mxu0 %v2586_v3  ;;  %2736 = vmatpush.msra.mxu1 %v4388_v61  ;;  %v1488_v52 = vpop.f32.mrf.mxu1  ;;  %v2831_v61 = vand.u32 4294901760, %v2830_v17  ;;  %v2837_v44 = vand.u32 4294901760, %v2836_v29 }
 0x138   :  { %2769 = vmatpush.msra.mxu2 %v4510_v49  ;;  %2820 = vmatpush.msra.mxu3 %v2819_v54  ;;  %v1489_v5 = vadd.f32 %v1488_v52, %v1458_v10  ;;  %v1533_v35 = vpop.f32.mrf.mxu2 }
 0x139   :  { %2641 = vmatmul.f32.vlgmr.msrb.gmra.mxu2 %v3284_v46  ;;  %2711 = vmatpush.msra.mxu0 %v2592_v58 }
 0x13a   :  { %2738 = vmatpush.msra.mxu1 %v4398_v30  ;;  %2771 = vmatpush.msra.mxu2 %v4528_v21  ;;  %v1534_v39 = vadd.f32 %v1533_v35, %v1489_v5 }
 0x13b   :  { %2826 = vmatpush.msra.mxu3 %v2825_v34  ;;  %2542 = vmatmul.f32.vlgmr.msrb.gmra.mxu0 %v3329_v18  ;;  %v1562_v3 = vpop.f32.mrf.mxu3 }
 0x13c   :  { %2672 = vmatmul.f32.vlgmr.msrb.gmra.mxu3 %v3303_v15  ;;  %2715 = vmatpush.msra.mxu0 %v2598_v26  ;;  %v1563_v25 = vadd.f32 %v1562_v3, %v1534_v39 }
 0x13d   :  { %2740 = vmatpush.msra.mxu1 %v4412_v63  ;;  %2773 = vmatpush.msra.mxu2 %v4540_v24 }
 0x13e   :  { %2832 = vmatpush.msra.mxu3 %v2831_v61  ;;  %2854 = vmatpush.msrb.mxu0 %v4461_v48  ;;  %2992 = vst [vmem:[#allocation7 + $0x28] sm:$0xff] %v1563_v25 }
 0x13f   :  { %2924 = vmatpush.msrb.mxu2 %v2793_v42  ;;  %2603 = vmatmul.f32.vlgmr.msrb.gmra.mxu1 %v3266_v37 }
 0x140   :  { %2742 = vmatpush.msra.mxu1 %v4428_v53  ;;  %2838 = vmatpush.msra.mxu3 %v2837_v44 }
 0x141   :  { %2857 = vmatpush.msrb.mxu0 %v4478_v22  ;;  %2928 = vmatpush.msrb.mxu2 %v2799_v19 }
 0x142   :  { %2967 = vmatpush.msrb.mxu3 %v4436_v31  ;;  %2744 = vmatpush.msra.mxu1 %v4440_v14 }
 0x143   :  { %2860 = vmatpush.msrb.mxu0 %v4492_v38  ;;  %2932 = vmatpush.msrb.mxu2 %v2805_v23 }
 0x144   :  { %2891 = vmatpush.msrb.mxu1 %v4436_v31  ;;  %2969 = vmatpush.msrb.mxu3 %v4453_v56 }
 0x145   :  { %2863 = vmatpush.msrb.mxu0 %v4504_v11  ;;  %2936 = vmatpush.msrb.mxu2 %v2811_v27 }
 0x146   :  { %2893 = vmatpush.msrb.mxu1 %v4453_v56  ;;  %2971 = vmatpush.msrb.mxu3 %v4468_v43 }
 0x147   :  { %2717 = vmatmul.f32.vlgmr.msra.gmra.mxu0 %v3266_v37  ;;  %2779 = vmatmul.f32.vlgmr.msra.gmra.mxu2 %v3329_v18 }
 0x148   :  { %2840 = vmatmul.f32.vlgmr.msra.gmra.mxu3 %v3266_v37  ;;  %2866 = vmatpush.msrb.mxu0 %v4519_v40 }
 0x149   :  { %2895 = vmatpush.msrb.mxu1 %v4468_v43  ;;  %2940 = vmatpush.msrb.mxu2 %v2817_v0 }
 0x14a   :  { %2973 = vmatpush.msrb.mxu3 %v4480_v36  ;;  %2746 = vmatmul.f32.vlgmr.msra.gmra.mxu1 %v3266_v37 }
 0x14b   :  { %2869 = vmatpush.msrb.mxu0 %v4532_v28  ;;  %2897 = vmatpush.msrb.mxu1 %v4480_v36 }
 0x14c   :  { %2944 = vmatpush.msrb.mxu2 %v2823_v55  ;;  %2975 = vmatpush.msrb.mxu3 %v4494_v50 }
 0x14d   :  { %2872 = vmatpush.msrb.mxu0 %v4550_v32  ;;  %2899 = vmatpush.msrb.mxu1 %v4494_v50 }
 0x14e   :  { %2948 = vmatpush.msrb.mxu2 %v2829_v57  ;;  %2977 = vmatpush.msrb.mxu3 %v4510_v49  ;;  %v1595_v18 = vpop.f32.mrf.mxu0 }
 0x14f   :  { %2875 = vmatpush.msrb.mxu0 %v4560_v41  ;;  %2901 = vmatpush.msrb.mxu1 %v4510_v49 }
 0x150   :  { %2952 = vmatpush.msrb.mxu2 %v2835_v13  ;;  %2979 = vmatpush.msrb.mxu3 %v4528_v21 }
 0x151   :  { %2878 = vmatmul.f32.vlgmr.msrb.gmra.mxu0 %v3284_v46  ;;  %2954 = vmatmul.f32.vlgmr.msrb.gmra.mxu2 %v3266_v37  ;;  %v1656_v30 = vpop.f32.mrf.mxu1 }
 0x152   :  { %2903 = vmatpush.msrb.mxu1 %v4528_v21  ;;  %2981 = vmatpush.msrb.mxu3 %v4540_v24  ;;  %v1657_v63 = vadd.f32 %v1656_v30, %v1595_v18  ;;  %v1694_v53 = vpop.f32.mrf.mxu2 }
 0x153   :  { %2983 = vmatmul.f32.vlgmr.msrb.gmra.mxu3 %v3266_v37 }
 0x154   :  { %2905 = vmatpush.msrb.mxu1 %v4540_v24  ;;  %v1695_v31 = vadd.f32 %v1694_v53, %v1657_v63 }
 0x155   :  { %2909 = vmatmul.f32.vlgmr.msrb.gmra.mxu1 %v3303_v15  ;;  %v1725_v14 = vpop.f32.mrf.mxu3 }
 0x156   :  { %v1726_v1 = vadd.f32 %v1725_v14, %v1695_v31 }
 0x158   :  { %v1770_v56 = vpop.f32.mrf.mxu0 }
 0x159   :  { %v1771_v46 = vadd.f32 %v1770_v56, %v1726_v1 }
 0x15a   :  { %v1799_v48 = vpop.f32.mrf.mxu1 }
 0x15b   :  { %v1800_v60 = vadd.f32 %v1799_v48, %v1771_v46 }
 0x15d   :  { %2993 = vst [vmem:[#allocation7 + $0x30] sm:$0xff] %v1800_v60 }
 0x165   :  { %v1832_v43 = vpop.f32.mrf.mxu2 }
 0x168   :  { %v1893_v58 = vpop.f32.mrf.mxu3 }
 0x169   :  { %v1894_v22 = vadd.f32 %v1893_v58, %v1832_v43 }
 0x16a   :  { %v1931_v36 = vpop.f32.mrf.mxu0 }
 0x16b   :  { %v1932_v42 = vadd.f32 %v1931_v36, %v1894_v22 }
 0x16d   :  { %v1962_v26 = vpop.f32.mrf.mxu1 }
 0x16e   :  { %v1963_v38 = vadd.f32 %v1962_v26, %v1932_v42  ;;  %v2007_v37 = vpop.f32.mrf.mxu2 }
 0x170   :  { %v2008_v50 = vadd.f32 %v2007_v37, %v1963_v38 }
 0x171   :  { %v2036_v19 = vpop.f32.mrf.mxu3 }
 0x172   :  { %v2037_v11 = vadd.f32 %v2036_v19, %v2008_v50 }
 0x174   :  { %2994 = vst [vmem:[#allocation7 + $0x38] sm:$0xff] %v2037_v11 }
 0x184   :  { %v2069_v15 = vpop.f32.mrf.mxu0 }
 0x187   :  { %v2130_v49 = vpop.f32.mrf.mxu1 }
 0x188   :  { %v2131_v23 = vadd.f32 %v2130_v49, %v2069_v15  ;;  %v2168_v40 = vpop.f32.mrf.mxu2 }
 0x18a   :  { %v2169_v4 = vadd.f32 %v2168_v40, %v2131_v23 }
 0x18b   :  { %v2199_v12 = vpop.f32.mrf.mxu3 }
 0x18c   :  { %v2200_v27 = vadd.f32 %v2199_v12, %v2169_v4 }
 0x18e   :  { %v2244_v21 = vpop.f32.mrf.mxu0 }
 0x18f   :  { %v2245_v7 = vadd.f32 %v2244_v21, %v2200_v27 }
 0x190   :  { %v2273_v28 = vpop.f32.mrf.mxu1 }
 0x191   :  { %v2274_v9 = vadd.f32 %v2273_v28, %v2245_v7 }
 0x193   :  { %2995 = vst [vmem:[#allocation7 + $0x40] sm:$0xff] %v2274_v9 }
 0x19b   :  { %v2306_v6 = vpop.f32.mrf.mxu2 }
 0x19e   :  { %v2367_v0 = vpop.f32.mrf.mxu3 }
 0x19f   :  { %v2368_v24 = vadd.f32 %v2367_v0, %v2306_v6 }
 0x1a0   :  { %v2405_v20 = vpop.f32.mrf.mxu0 }
 0x1a1   :  { %v2406_v62 = vadd.f32 %v2405_v20, %v2368_v24 }
 0x1a3   :  { %v2436_v32 = vpop.f32.mrf.mxu1 }
 0x1a4   :  { %v2437_v55 = vadd.f32 %v2436_v32, %v2406_v62  ;;  %v2481_v47 = vpop.f32.mrf.mxu2 }
 0x1a6   :  { %v2482_v8 = vadd.f32 %v2481_v47, %v2437_v55 }
 0x1a7   :  { %v2510_v16 = vpop.f32.mrf.mxu3 }
 0x1a8   :  { %v2511_v41 = vadd.f32 %v2510_v16, %v2482_v8 }
 0x1aa   :  { %2996 = vst [vmem:[#allocation7 + $0x48] sm:$0xff] %v2511_v41 }
 0x1b8   :  { %v2543_v51 = vpop.f32.mrf.mxu0 }
 0x1bc   :  { %v2604_v57 = vpop.f32.mrf.mxu1  ;;  %v2642_v45 = vpop.f32.mrf.mxu2 }
 0x1bd   :  { %v2605_v59 = vadd.f32 %v2604_v57, %v2543_v51 }
 0x1bf   :  { %v2643_v2 = vadd.f32 %v2642_v45, %v2605_v59  ;;  %v2673_v54 = vpop.f32.mrf.mxu3 }
 0x1c1   :  { %v2674_v13 = vadd.f32 %v2673_v54, %v2643_v2 }
 0x1c4   :  { %v2718_v33 = vpop.f32.mrf.mxu0 }
 0x1c5   :  { %v2719_v10 = vadd.f32 %v2718_v33, %v2674_v13 }
 0x1c7   :  { %v2747_v17 = vpop.f32.mrf.mxu1 }
 0x1c8   :  { %v2748_v34 = vadd.f32 %v2747_v17, %v2719_v10 }
 0x1ca   :  { %2997 = vst [vmem:[#allocation7 + $0x50] sm:$0xff] %v2748_v34  ;;  %v2780_v52 = vpop.f32.mrf.mxu2 }
 0x1cb   :  { %v2841_v29 = vpop.f32.mrf.mxu3 }
 0x1cc   :  { %v2842_v5 = vadd.f32 %v2841_v29, %v2780_v52 }
 0x1ce   :  { %v2879_v35 = vpop.f32.mrf.mxu0 }
 0x1cf   :  { %v2880_v61 = vadd.f32 %v2879_v35, %v2842_v5 }
 0x1d2   :  { %v2910_v39 = vpop.f32.mrf.mxu1 }
 0x1d3   :  { %v2911_v3 = vadd.f32 %v2910_v39, %v2880_v61 }
 0x1d4   :  { %v2955_v44 = vpop.f32.mrf.mxu2 }
 0x1d5   :  { %v2956_v25 = vadd.f32 %v2955_v44, %v2911_v3 }
 0x1d6   :  { %v2984_v18 = vpop.f32.mrf.mxu3 }
 0x1d7   :  { %v2985_v30 = vadd.f32 %v2984_v18, %v2956_v25 }
 0x1d9   :  { %2998 = vst [vmem:[#allocation7 + $0x58] sm:$0xff] %v2985_v30 }
 0x1da   :  { %3009 = dma.vmem_to_hbm [thread:$0]  %s3005_s1, 1536, %s3007_s23, [#allocation4]  }
 0x1db   :  { %3098 = dma.done.wait [#allocation4], 1536  }
 0x1dc   :  { %3099 = vsyncadd [#allocation4], 4294965760 }
 0x1dd   :  { %3014 = vsyncpa [#allocation3], 1 }
 0x1de   :  { %3015 = vsyncpa [#allocation6], 1 }
 0x1df   :  { %3016 = vsyncpa [#allocation4], 1 }

</bundles_post_ra>
